<compile_context>
chip_gen: v7x
topology: tpu7x:2x2x1
jax: 0.10.0
libtpu: 0.0.40
codegen_flags: <defaults>
</compile_context>

<pallas_src>
import math

import jax
import jax.numpy as jnp
import numpy as np
from jax.experimental import pallas as pl
from jax.experimental.pallas import tpu as pltpu

D_MODEL = 512
N_HEADS = 8
D_K = 8
D_V = 8
LN_EPS = 1e-5  # nn.LayerNorm default


def _mha_kernel(xq_ref, xk_ref, xv_ref, bias_ref, wqkv_ref, wo_ref,
                out_ref, attn_ref):
    BB, S, D = xq_ref.shape          # batch-block, seq, d_model
    M = BB * S
    HD = N_HEADS * D_K               # 64

    # Activations in f32 (residual + LayerNorm need full precision).
    xq = xq_ref[...].reshape(M, D)
    xk = xk_ref[...].reshape(M, D)
    xv = xv_ref[...].reshape(M, D)

    # ---- fused QKV projection: ONE bf16 MXU matmul, f32 accumulation -------
    # rows  [0:M)   x_q,  [M:2M) x_k,  [2M:3M) x_v
    # cols  [0:64)  W_Q,  [64:128) W_K, [128:192) W_V
    x_all = jnp.concatenate([xq, xk, xv], axis=0).astype(jnp.bfloat16)   # (3M, D)
    qkv = jnp.dot(x_all, wqkv_ref[...],
                  preferred_element_type=jnp.float32)                    # (3M, 192)

    scale = 1.0 / math.sqrt(D_K)
    q = (qkv[0:M, 0:HD] * scale).astype(jnp.bfloat16).reshape(BB, S, HD)
    k = qkv[M:2 * M, HD:2 * HD].astype(jnp.bfloat16).reshape(BB, S, HD)
    v = qkv[2 * M:3 * M, 2 * HD:3 * HD].astype(jnp.bfloat16).reshape(BB, S, HD)

    bias = bias_ref[...].astype(jnp.float32)                             # (BB, S, S)

    # ---- per-head attention (static 8-wide column slices, no transposes) ---
    ctx_parts = []
    for h in range(N_HEADS):
        qh = q[:, :, h * D_K:(h + 1) * D_K]          # (BB, S, dk) bf16
        kh = k[:, :, h * D_K:(h + 1) * D_K]
        vh = v[:, :, h * D_V:(h + 1) * D_V]

        s = jax.lax.dot_general(
            qh, kh, (((2,), (2,)), ((0,), (0,))),
            preferred_element_type=jnp.float32)      # (BB, S, S), S on lanes
        s = s + bias                                  # masked entries ~ -1e9

        m = jnp.max(s, axis=-1, keepdims=True)
        e = jnp.exp(s - m)
        denom = jnp.sum(e, axis=-1, keepdims=True)
        a = e * pl.reciprocal(denom, approx=True)     # softmax, EUP reciprocal

        attn_ref[:, h, :, :] = a.astype(attn_ref.dtype)

        ctx_parts.append(jax.lax.dot_general(
            a.astype(jnp.bfloat16), vh, (((2,), (1,)), ((0,), (0,))),
            preferred_element_type=jnp.float32))      # (BB, S, dv)

    context = jnp.concatenate(ctx_parts, axis=-1).reshape(M, N_HEADS * D_V)

    # ---- output projection + residual + LayerNorm (gamma=1, beta=0) --------
    out = jnp.dot(context.astype(jnp.bfloat16), wo_ref[...],
                  preferred_element_type=jnp.float32)                    # (M, D)
    out = out + xq                                                       # residual

    # one-pass statistics: mean and E[x^2]
    s1 = jnp.sum(out, axis=-1, keepdims=True)
    s2 = jnp.sum(out * out, axis=-1, keepdims=True)
    mu = s1 * (1.0 / D)
    var = s2 * (1.0 / D) - mu * mu                                       # biased var
    normed = (out - mu) * jax.lax.rsqrt(var + LN_EPS)

    out_ref[...] = normed.reshape(BB, S, D).astype(out_ref.dtype)


def _pick_block_b(batch, seq, target_rows=256):
    """Largest divisor of `batch` keeping block_b * seq <= target_rows."""
    best = 1
    for cand in range(1, batch + 1):
        if batch % cand == 0 and cand * seq <= target_rows:
            best = cand
    return best


@jax.jit
def multi_head_attention(input_q, input_k, input_v, attn_mask,
                         w_q, w_k, w_v, w_o):
    """w_* are [in, out] (PyTorch weight.T). attn_mask: [B, S, S], nonzero = masked."""
    B, S, D = input_q.shape
    assert D == D_MODEL
    HD = N_HEADS * D_K

    block_b = _pick_block_b(B, S)
    grid = (B // block_b,)

    # Fused bf16 QKV weight (one DMA / one matmul) + bf16 output weight.
    w_qkv = jnp.concatenate([w_q, w_k, w_v], axis=1).astype(jnp.bfloat16)  # (D, 192)
    w_o_bf = w_o.astype(jnp.bfloat16)                                      # (64, D)

    # Mask -> bf16 additive bias (0 where kept, -1e9 where masked).
    bias = jnp.where(attn_mask != 0, jnp.float32(-1e9),
                     jnp.float32(0.0)).astype(jnp.bfloat16)                # (B, S, S)

    act_spec = pl.BlockSpec((block_b, S, D), lambda b: (b, 0, 0))
    bias_spec = pl.BlockSpec((block_b, S, S), lambda b: (b, 0, 0))
    wqkv_spec = pl.BlockSpec((D, 3 * HD), lambda b: (0, 0))
    wo_spec = pl.BlockSpec((N_HEADS * D_V, D), lambda b: (0, 0))

    out, attn = pl.pallas_call(
        _mha_kernel,
        out_shape=(
            jax.ShapeDtypeStruct((B, S, D), jnp.float32),
            jax.ShapeDtypeStruct((B, N_HEADS, S, S), jnp.float32),
        ),
        grid_spec=pltpu.PrefetchScalarGridSpec(
            num_scalar_prefetch=0,
            grid=grid,
            in_specs=[act_spec, act_spec, act_spec, bias_spec,
                      wqkv_spec, wo_spec],
            out_specs=[
                pl.BlockSpec((block_b, S, D), lambda b: (b, 0, 0)),
                pl.BlockSpec((block_b, N_HEADS, S, S), lambda b: (b, 0, 0, 0)),
            ],
        ),
        compiler_params=pltpu.CompilerParams(
            dimension_semantics=("parallel",)),
    )(input_q, input_k, input_v, bias, w_qkv, w_o_bf)
    return out, attn


def _reference(input_q, input_k, input_v, attn_mask, w_q, w_k, w_v, w_o):
    """Pure-JAX f32 reference mirroring the PyTorch module."""
    B, S, D = input_q.shape
    q = (input_q @ w_q).reshape(B, S, N_HEADS, D_K).transpose(0, 2, 1, 3)
    k = (input_k @ w_k).reshape(B, S, N_HEADS, D_K).transpose(0, 2, 1, 3)
    v = (input_v @ w_v).reshape(B, S, N_HEADS, D_V).transpose(0, 2, 1, 3)
    scores = jnp.einsum('bhqd,bhkd->bhqk', q, k) / np.sqrt(D_K)
    scores = jnp.where(attn_mask[:, None, :, :] != 0, -1e9, scores)
    attn = jax.nn.softmax(scores, axis=-1)
    context = jnp.einsum('bhqk,bhkd->bhqd', attn, v)
    context = context.transpose(0, 2, 1, 3).reshape(B, S, N_HEADS * D_V)
    out = context @ w_o + input_q
    mu = out.mean(-1, keepdims=True)
    var = ((out - mu) ** 2).mean(-1, keepdims=True)
    return (out - mu) / jnp.sqrt(var + LN_EPS), attn


if __name__ == "__main__":
    B, S = 2, 8

    key = jax.random.PRNGKey(0)
    k1, k2, k3, k4, k5, k6, k7 = jax.random.split(key, 7)

    # deterministic synthetic parameters (nn.Linear shapes, stored as [in, out])
    w_q = (jax.random.normal(k1, (D_MODEL, N_HEADS * D_K), jnp.float32)
           / math.sqrt(D_MODEL))
    w_k = (jax.random.normal(k2, (D_MODEL, N_HEADS * D_K), jnp.float32)
           / math.sqrt(D_MODEL))
    w_v = (jax.random.normal(k3, (D_MODEL, N_HEADS * D_V), jnp.float32)
           / math.sqrt(D_MODEL))
    w_o = (jax.random.normal(k4, (N_HEADS * D_V, D_MODEL), jnp.float32)
           / math.sqrt(N_HEADS * D_V))

    input_q = jax.random.normal(k5, (B, S, D_MODEL), jnp.float32)
    input_k = jax.random.normal(k6, (B, S, D_MODEL), jnp.float32)
    input_v = jax.random.normal(k7, (B, S, D_MODEL), jnp.float32)
    # causal-style mask (nonzero == masked)
    attn_mask = (jnp.triu(jnp.ones((S, S), jnp.int32), k=1)[None]
                 .repeat(B, axis=0)).astype(jnp.int32)

    out, attn = multi_head_attention(input_q, input_k, input_v, attn_mask,
                                     w_q, w_k, w_v, w_o)
    jax.block_until_ready((out, attn))

    out_ref, attn_ref = _reference(input_q, input_k, input_v, attn_mask,
                                   w_q, w_k, w_v, w_o)

    out_np, attn_np = np.asarray(out), np.asarray(attn)
    # bf16 matmul inputs + approx reciprocal -> mixed-precision tolerances.
    assert np.allclose(out_np, np.asarray(out_ref), atol=5e-2, rtol=5e-2)
    assert np.allclose(attn_np, np.asarray(attn_ref), atol=2e-2, rtol=2e-2)
    # structural invariants of softmax + masking
    assert np.allclose(attn_np.sum(-1), 1.0, atol=1e-2)
    assert np.all(attn_np[:, :, np.asarray(attn_mask[0]) != 0] == 0.0)

    print("KERNEL_OK")
</pallas_src>

<mosaic_0001>
module attributes {stable_mosaic.version = 11 : i64} {
  func.func @_mha_kernel(%arg0: i32, %arg1: memref<2x8x512xf32, #tpu.memory_space<vmem>>, %arg2: memref<2x8x512xf32, #tpu.memory_space<vmem>>, %arg3: memref<2x8x512xf32, #tpu.memory_space<vmem>>, %arg4: memref<2x8x8xbf16, #tpu.memory_space<vmem>>, %arg5: memref<512x192xbf16, #tpu.memory_space<vmem>>, %arg6: memref<64x512xbf16, #tpu.memory_space<vmem>>, %arg7: memref<2x8x512xf32, #tpu.memory_space<vmem>>, %arg8: memref<2x8x8x8xf32, #tpu.memory_space<vmem>>) attributes {dimension_semantics = [#tpu.dimension_semantics<parallel>], iteration_bounds = array<i64: 1>, scalar_prefetch = 0 : i64, scratch_operands = 0 : i64, tpu.core_type = #tpu.core_type<tc>, window_params = [{transform_indices = @transform_0, window_bounds = array<i64: 2, 8, 512>}, {transform_indices = @transform_1, window_bounds = array<i64: 2, 8, 512>}, {transform_indices = @transform_2, window_bounds = array<i64: 2, 8, 512>}, {transform_indices = @transform_3, window_bounds = array<i64: 2, 8, 8>}, {pipeline_mode = #tpu.pipeline_mode<synchronous>, transform_indices = @transform_4, window_bounds = array<i64: 512, 192>}, {pipeline_mode = #tpu.pipeline_mode<synchronous>, transform_indices = @transform_5, window_bounds = array<i64: 64, 512>}, {transform_indices = @transform_6, window_bounds = array<i64: 2, 8, 512>}, {transform_indices = @transform_7, window_bounds = array<i64: 2, 8, 8, 8>}]} {
    %c0 = arith.constant 0 : index
    %c0_0 = arith.constant 0 : index
    %c0_1 = arith.constant 0 : index
    %0 = vector.load %arg1[%c0, %c0_0, %c0_1] : memref<2x8x512xf32, #tpu.memory_space<vmem>>, vector<2x8x512xf32>
    %1 = vector.shape_cast %0 : vector<2x8x512xf32> to vector<16x512xf32>
    %c0_2 = arith.constant 0 : index
    %c0_3 = arith.constant 0 : index
    %c0_4 = arith.constant 0 : index
    %2 = vector.load %arg2[%c0_2, %c0_3, %c0_4] : memref<2x8x512xf32, #tpu.memory_space<vmem>>, vector<2x8x512xf32>
    %3 = vector.shape_cast %2 : vector<2x8x512xf32> to vector<16x512xf32>
    %c0_5 = arith.constant 0 : index
    %c0_6 = arith.constant 0 : index
    %c0_7 = arith.constant 0 : index
    %4 = vector.load %arg3[%c0_5, %c0_6, %c0_7] : memref<2x8x512xf32, #tpu.memory_space<vmem>>, vector<2x8x512xf32>
    %5 = vector.shape_cast %4 : vector<2x8x512xf32> to vector<16x512xf32>
    %6 = tpu.concatenate %1, %3, %5 in 0 : vector<16x512xf32>, vector<16x512xf32>, vector<16x512xf32> -> vector<48x512xf32>
    %7 = arith.truncf %6 : vector<48x512xf32> to vector<48x512xbf16>
    %c0_8 = arith.constant 0 : index
    %c0_9 = arith.constant 0 : index
    %8 = vector.load %arg5[%c0_8, %c0_9] : memref<512x192xbf16, #tpu.memory_space<vmem>>, vector<512x192xbf16>
    %cst = arith.constant dense<0.000000e+00> : vector<48x192xf32>
    %9 = tpu.matmul %7, %8, %cst {dimension_numbers = #tpu.dot_dimension_numbers<[1], [0], [0], [1], [0, 0, 1, 1], [], []>} : vector<48x512xbf16>, vector<512x192xbf16>, vector<48x192xf32> -> vector<48x192xf32>
    %10 = vector.extract_strided_slice %9 {offsets = [0, 0], sizes = [16, 64], strides = [1, 1]} : vector<48x192xf32> to vector<16x64xf32>
    %cst_10 = arith.constant 0.353553385 : f32
    %11 = vector.broadcast %cst_10 : f32 to vector<16x64xf32>
    %12 = arith.mulf %10, %11 : vector<16x64xf32>
    %13 = arith.truncf %12 : vector<16x64xf32> to vector<16x64xbf16>
    %14 = vector.shape_cast %13 : vector<16x64xbf16> to vector<2x8x64xbf16>
    %15 = vector.extract_strided_slice %9 {offsets = [16, 64], sizes = [16, 64], strides = [1, 1]} : vector<48x192xf32> to vector<16x64xf32>
    %16 = arith.truncf %15 : vector<16x64xf32> to vector<16x64xbf16>
    %17 = vector.shape_cast %16 : vector<16x64xbf16> to vector<2x8x64xbf16>
    %18 = vector.extract_strided_slice %9 {offsets = [32, 128], sizes = [16, 64], strides = [1, 1]} : vector<48x192xf32> to vector<16x64xf32>
    %19 = arith.truncf %18 : vector<16x64xf32> to vector<16x64xbf16>
    %20 = vector.shape_cast %19 : vector<16x64xbf16> to vector<2x8x64xbf16>
    %c0_11 = arith.constant 0 : index
    %c0_12 = arith.constant 0 : index
    %c0_13 = arith.constant 0 : index
    %21 = vector.load %arg4[%c0_11, %c0_12, %c0_13] : memref<2x8x8xbf16, #tpu.memory_space<vmem>>, vector<2x8x8xbf16>
    %22 = arith.extf %21 : vector<2x8x8xbf16> to vector<2x8x8xf32>
    %23 = vector.extract_strided_slice %14 {offsets = [0, 0, 0], sizes = [2, 8, 8], strides = [1, 1, 1]} : vector<2x8x64xbf16> to vector<2x8x8xbf16>
    %24 = vector.extract_strided_slice %17 {offsets = [0, 0, 0], sizes = [2, 8, 8], strides = [1, 1, 1]} : vector<2x8x64xbf16> to vector<2x8x8xbf16>
    %25 = vector.extract_strided_slice %20 {offsets = [0, 0, 0], sizes = [2, 8, 8], strides = [1, 1, 1]} : vector<2x8x64xbf16> to vector<2x8x8xbf16>
    %cst_14 = arith.constant dense<0.000000e+00> : vector<2x8x8xf32>
    %26 = tpu.matmul %23, %24, %cst_14 {dimension_numbers = #tpu.dot_dimension_numbers<[2], [2], [1], [1], [0, 0, 0, 1, 1, 1], [0], [0]>} : vector<2x8x8xbf16>, vector<2x8x8xbf16>, vector<2x8x8xf32> -> vector<2x8x8xf32>
    %27 = arith.addf %26, %22 : vector<2x8x8xf32>
    %cst_15 = arith.constant dense<0xFF800000> : vector<2x8xf32>
    %28 = vector.multi_reduction <maximumf>, %27, %cst_15 [2] : vector<2x8x8xf32> to vector<2x8xf32>
    %29 = vector.shape_cast %28 : vector<2x8xf32> to vector<2x8x1xf32>
    %30 = vector.broadcast %29 : vector<2x8x1xf32> to vector<2x8x8xf32>
    %31 = arith.subf %27, %30 : vector<2x8x8xf32>
    %32 = math.exp %31 : vector<2x8x8xf32>
    %cst_16 = arith.constant dense<0.000000e+00> : vector<2x8xf32>
    %33 = vector.multi_reduction <add>, %32, %cst_16 [2] : vector<2x8x8xf32> to vector<2x8xf32>
    %34 = vector.shape_cast %33 : vector<2x8xf32> to vector<2x8x1xf32>
    %35 = tpu.reciprocal %34 {approx = true} : vector<2x8x1xf32> -> vector<2x8x1xf32>
    %36 = vector.broadcast %35 : vector<2x8x1xf32> to vector<2x8x8xf32>
    %37 = arith.mulf %32, %36 : vector<2x8x8xf32>
    %c0_17 = arith.constant 0 : index
    %c0_18 = arith.constant 0 : index
    %c0_19 = arith.constant 0 : index
    %c0_20 = arith.constant 0 : index
    %38 = vector.load %arg8[%c0_17, %c0_18, %c0_19, %c0_20] : memref<2x8x8x8xf32, #tpu.memory_space<vmem>>, vector<2x1x8x8xf32>
    %39 = vector.shape_cast %38 : vector<2x1x8x8xf32> to vector<2x8x8xf32>
    %40 = vector.shape_cast %37 : vector<2x8x8xf32> to vector<2x1x8x8xf32>
    tpu.vector_store %arg8[%c0_17, %c0_18, %c0_19, %c0_20], %40 {strides = array<i32>} : memref<2x8x8x8xf32, #tpu.memory_space<vmem>>, vector<2x1x8x8xf32>,
    %41 = arith.truncf %37 : vector<2x8x8xf32> to vector<2x8x8xbf16>
    %cst_21 = arith.constant dense<0.000000e+00> : vector<2x8x8xf32>
    %42 = tpu.matmul %41, %25, %cst_21 {dimension_numbers = #tpu.dot_dimension_numbers<[2], [1], [1], [2], [0, 0, 0, 1, 1, 2], [0], [0]>} : vector<2x8x8xbf16>, vector<2x8x8xbf16>, vector<2x8x8xf32> -> vector<2x8x8xf32>
    %43 = vector.extract_strided_slice %14 {offsets = [0, 0, 8], sizes = [2, 8, 8], strides = [1, 1, 1]} : vector<2x8x64xbf16> to vector<2x8x8xbf16>
    %44 = vector.extract_strided_slice %17 {offsets = [0, 0, 8], sizes = [2, 8, 8], strides = [1, 1, 1]} : vector<2x8x64xbf16> to vector<2x8x8xbf16>
    %45 = vector.extract_strided_slice %20 {offsets = [0, 0, 8], sizes = [2, 8, 8], strides = [1, 1, 1]} : vector<2x8x64xbf16> to vector<2x8x8xbf16>
    %cst_22 = arith.constant dense<0.000000e+00> : vector<2x8x8xf32>
    %46 = tpu.matmul %43, %44, %cst_22 {dimension_numbers = #tpu.dot_dimension_numbers<[2], [2], [1], [1], [0, 0, 0, 1, 1, 1], [0], [0]>} : vector<2x8x8xbf16>, vector<2x8x8xbf16>, vector<2x8x8xf32> -> vector<2x8x8xf32>
    %47 = arith.addf %46, %22 : vector<2x8x8xf32>
    %cst_23 = arith.constant dense<0xFF800000> : vector<2x8xf32>
    %48 = vector.multi_reduction <maximumf>, %47, %cst_23 [2] : vector<2x8x8xf32> to vector<2x8xf32>
    %49 = vector.shape_cast %48 : vector<2x8xf32> to vector<2x8x1xf32>
    %50 = vector.broadcast %49 : vector<2x8x1xf32> to vector<2x8x8xf32>
    %51 = arith.subf %47, %50 : vector<2x8x8xf32>
    %52 = math.exp %51 : vector<2x8x8xf32>
    %cst_24 = arith.constant dense<0.000000e+00> : vector<2x8xf32>
    %53 = vector.multi_reduction <add>, %52, %cst_24 [2] : vector<2x8x8xf32> to vector<2x8xf32>
    %54 = vector.shape_cast %53 : vector<2x8xf32> to vector<2x8x1xf32>
    %55 = tpu.reciprocal %54 {approx = true} : vector<2x8x1xf32> -> vector<2x8x1xf32>
    %56 = vector.broadcast %55 : vector<2x8x1xf32> to vector<2x8x8xf32>
    %57 = arith.mulf %52, %56 : vector<2x8x8xf32>
    %c0_25 = arith.constant 0 : index
    %c1 = arith.constant 1 : index
    %c0_26 = arith.constant 0 : index
    %c0_27 = arith.constant 0 : index
    %58 = vector.load %arg8[%c0_25, %c1, %c0_26, %c0_27] : memref<2x8x8x8xf32, #tpu.memory_space<vmem>>, vector<2x1x8x8xf32>
    %59 = vector.shape_cast %58 : vector<2x1x8x8xf32> to vector<2x8x8xf32>
    %60 = vector.shape_cast %57 : vector<2x8x8xf32> to vector<2x1x8x8xf32>
    tpu.vector_store %arg8[%c0_25, %c1, %c0_26, %c0_27], %60 {strides = array<i32>} : memref<2x8x8x8xf32, #tpu.memory_space<vmem>>, vector<2x1x8x8xf32>,
    %61 = arith.truncf %57 : vector<2x8x8xf32> to vector<2x8x8xbf16>
    %cst_28 = arith.constant dense<0.000000e+00> : vector<2x8x8xf32>
    %62 = tpu.matmul %61, %45, %cst_28 {dimension_numbers = #tpu.dot_dimension_numbers<[2], [1], [1], [2], [0, 0, 0, 1, 1, 2], [0], [0]>} : vector<2x8x8xbf16>, vector<2x8x8xbf16>, vector<2x8x8xf32> -> vector<2x8x8xf32>
    %63 = vector.extract_strided_slice %14 {offsets = [0, 0, 16], sizes = [2, 8, 8], strides = [1, 1, 1]} : vector<2x8x64xbf16> to vector<2x8x8xbf16>
    %64 = vector.extract_strided_slice %17 {offsets = [0, 0, 16], sizes = [2, 8, 8], strides = [1, 1, 1]} : vector<2x8x64xbf16> to vector<2x8x8xbf16>
    %65 = vector.extract_strided_slice %20 {offsets = [0, 0, 16], sizes = [2, 8, 8], strides = [1, 1, 1]} : vector<2x8x64xbf16> to vector<2x8x8xbf16>
    %cst_29 = arith.constant dense<0.000000e+00> : vector<2x8x8xf32>
    %66 = tpu.matmul %63, %64, %cst_29 {dimension_numbers = #tpu.dot_dimension_numbers<[2], [2], [1], [1], [0, 0, 0, 1, 1, 1], [0], [0]>} : vector<2x8x8xbf16>, vector<2x8x8xbf16>, vector<2x8x8xf32> -> vector<2x8x8xf32>
    %67 = arith.addf %66, %22 : vector<2x8x8xf32>
    %cst_30 = arith.constant dense<0xFF800000> : vector<2x8xf32>
    %68 = vector.multi_reduction <maximumf>, %67, %cst_30 [2] : vector<2x8x8xf32> to vector<2x8xf32>
    %69 = vector.shape_cast %68 : vector<2x8xf32> to vector<2x8x1xf32>
    %70 = vector.broadcast %69 : vector<2x8x1xf32> to vector<2x8x8xf32>
    %71 = arith.subf %67, %70 : vector<2x8x8xf32>
    %72 = math.exp %71 : vector<2x8x8xf32>
    %cst_31 = arith.constant dense<0.000000e+00> : vector<2x8xf32>
    %73 = vector.multi_reduction <add>, %72, %cst_31 [2] : vector<2x8x8xf32> to vector<2x8xf32>
    %74 = vector.shape_cast %73 : vector<2x8xf32> to vector<2x8x1xf32>
    %75 = tpu.reciprocal %74 {approx = true} : vector<2x8x1xf32> -> vector<2x8x1xf32>
    %76 = vector.broadcast %75 : vector<2x8x1xf32> to vector<2x8x8xf32>
    %77 = arith.mulf %72, %76 : vector<2x8x8xf32>
    %c0_32 = arith.constant 0 : index
    %c2 = arith.constant 2 : index
    %c0_33 = arith.constant 0 : index
    %c0_34 = arith.constant 0 : index
    %78 = vector.load %arg8[%c0_32, %c2, %c0_33, %c0_34] : memref<2x8x8x8xf32, #tpu.memory_space<vmem>>, vector<2x1x8x8xf32>
    %79 = vector.shape_cast %78 : vector<2x1x8x8xf32> to vector<2x8x8xf32>
    %80 = vector.shape_cast %77 : vector<2x8x8xf32> to vector<2x1x8x8xf32>
    tpu.vector_store %arg8[%c0_32, %c2, %c0_33, %c0_34], %80 {strides = array<i32>} : memref<2x8x8x8xf32, #tpu.memory_space<vmem>>, vector<2x1x8x8xf32>,
    %81 = arith.truncf %77 : vector<2x8x8xf32> to vector<2x8x8xbf16>
    %cst_35 = arith.constant dense<0.000000e+00> : vector<2x8x8xf32>
    %82 = tpu.matmul %81, %65, %cst_35 {dimension_numbers = #tpu.dot_dimension_numbers<[2], [1], [1], [2], [0, 0, 0, 1, 1, 2], [0], [0]>} : vector<2x8x8xbf16>, vector<2x8x8xbf16>, vector<2x8x8xf32> -> vector<2x8x8xf32>
    %83 = vector.extract_strided_slice %14 {offsets = [0, 0, 24], sizes = [2, 8, 8], strides = [1, 1, 1]} : vector<2x8x64xbf16> to vector<2x8x8xbf16>
    %84 = vector.extract_strided_slice %17 {offsets = [0, 0, 24], sizes = [2, 8, 8], strides = [1, 1, 1]} : vector<2x8x64xbf16> to vector<2x8x8xbf16>
    %85 = vector.extract_strided_slice %20 {offsets = [0, 0, 24], sizes = [2, 8, 8], strides = [1, 1, 1]} : vector<2x8x64xbf16> to vector<2x8x8xbf16>
    %cst_36 = arith.constant dense<0.000000e+00> : vector<2x8x8xf32>
    %86 = tpu.matmul %83, %84, %cst_36 {dimension_numbers = #tpu.dot_dimension_numbers<[2], [2], [1], [1], [0, 0, 0, 1, 1, 1], [0], [0]>} : vector<2x8x8xbf16>, vector<2x8x8xbf16>, vector<2x8x8xf32> -> vector<2x8x8xf32>
    %87 = arith.addf %86, %22 : vector<2x8x8xf32>
    %cst_37 = arith.constant dense<0xFF800000> : vector<2x8xf32>
    %88 = vector.multi_reduction <maximumf>, %87, %cst_37 [2] : vector<2x8x8xf32> to vector<2x8xf32>
    %89 = vector.shape_cast %88 : vector<2x8xf32> to vector<2x8x1xf32>
    %90 = vector.broadcast %89 : vector<2x8x1xf32> to vector<2x8x8xf32>
    %91 = arith.subf %87, %90 : vector<2x8x8xf32>
    %92 = math.exp %91 : vector<2x8x8xf32>
    %cst_38 = arith.constant dense<0.000000e+00> : vector<2x8xf32>
    %93 = vector.multi_reduction <add>, %92, %cst_38 [2] : vector<2x8x8xf32> to vector<2x8xf32>
    %94 = vector.shape_cast %93 : vector<2x8xf32> to vector<2x8x1xf32>
    %95 = tpu.reciprocal %94 {approx = true} : vector<2x8x1xf32> -> vector<2x8x1xf32>
    %96 = vector.broadcast %95 : vector<2x8x1xf32> to vector<2x8x8xf32>
    %97 = arith.mulf %92, %96 : vector<2x8x8xf32>
    %c0_39 = arith.constant 0 : index
    %c3 = arith.constant 3 : index
    %c0_40 = arith.constant 0 : index
    %c0_41 = arith.constant 0 : index
    %98 = vector.load %arg8[%c0_39, %c3, %c0_40, %c0_41] : memref<2x8x8x8xf32, #tpu.memory_space<vmem>>, vector<2x1x8x8xf32>
    %99 = vector.shape_cast %98 : vector<2x1x8x8xf32> to vector<2x8x8xf32>
    %100 = vector.shape_cast %97 : vector<2x8x8xf32> to vector<2x1x8x8xf32>
    tpu.vector_store %arg8[%c0_39, %c3, %c0_40, %c0_41], %100 {strides = array<i32>} : memref<2x8x8x8xf32, #tpu.memory_space<vmem>>, vector<2x1x8x8xf32>,
    %101 = arith.truncf %97 : vector<2x8x8xf32> to vector<2x8x8xbf16>
    %cst_42 = arith.constant dense<0.000000e+00> : vector<2x8x8xf32>
    %102 = tpu.matmul %101, %85, %cst_42 {dimension_numbers = #tpu.dot_dimension_numbers<[2], [1], [1], [2], [0, 0, 0, 1, 1, 2], [0], [0]>} : vector<2x8x8xbf16>, vector<2x8x8xbf16>, vector<2x8x8xf32> -> vector<2x8x8xf32>
    %103 = vector.extract_strided_slice %14 {offsets = [0, 0, 32], sizes = [2, 8, 8], strides = [1, 1, 1]} : vector<2x8x64xbf16> to vector<2x8x8xbf16>
    %104 = vector.extract_strided_slice %17 {offsets = [0, 0, 32], sizes = [2, 8, 8], strides = [1, 1, 1]} : vector<2x8x64xbf16> to vector<2x8x8xbf16>
    %105 = vector.extract_strided_slice %20 {offsets = [0, 0, 32], sizes = [2, 8, 8], strides = [1, 1, 1]} : vector<2x8x64xbf16> to vector<2x8x8xbf16>
    %cst_43 = arith.constant dense<0.000000e+00> : vector<2x8x8xf32>
    %106 = tpu.matmul %103, %104, %cst_43 {dimension_numbers = #tpu.dot_dimension_numbers<[2], [2], [1], [1], [0, 0, 0, 1, 1, 1], [0], [0]>} : vector<2x8x8xbf16>, vector<2x8x8xbf16>, vector<2x8x8xf32> -> vector<2x8x8xf32>
    %107 = arith.addf %106, %22 : vector<2x8x8xf32>
    %cst_44 = arith.constant dense<0xFF800000> : vector<2x8xf32>
    %108 = vector.multi_reduction <maximumf>, %107, %cst_44 [2] : vector<2x8x8xf32> to vector<2x8xf32>
    %109 = vector.shape_cast %108 : vector<2x8xf32> to vector<2x8x1xf32>
    %110 = vector.broadcast %109 : vector<2x8x1xf32> to vector<2x8x8xf32>
    %111 = arith.subf %107, %110 : vector<2x8x8xf32>
    %112 = math.exp %111 : vector<2x8x8xf32>
    %cst_45 = arith.constant dense<0.000000e+00> : vector<2x8xf32>
    %113 = vector.multi_reduction <add>, %112, %cst_45 [2] : vector<2x8x8xf32> to vector<2x8xf32>
    %114 = vector.shape_cast %113 : vector<2x8xf32> to vector<2x8x1xf32>
    %115 = tpu.reciprocal %114 {approx = true} : vector<2x8x1xf32> -> vector<2x8x1xf32>
    %116 = vector.broadcast %115 : vector<2x8x1xf32> to vector<2x8x8xf32>
    %117 = arith.mulf %112, %116 : vector<2x8x8xf32>
    %c0_46 = arith.constant 0 : index
    %c4 = arith.constant 4 : index
    %c0_47 = arith.constant 0 : index
    %c0_48 = arith.constant 0 : index
    %118 = vector.load %arg8[%c0_46, %c4, %c0_47, %c0_48] : memref<2x8x8x8xf32, #tpu.memory_space<vmem>>, vector<2x1x8x8xf32>
    %119 = vector.shape_cast %118 : vector<2x1x8x8xf32> to vector<2x8x8xf32>
    %120 = vector.shape_cast %117 : vector<2x8x8xf32> to vector<2x1x8x8xf32>
    tpu.vector_store %arg8[%c0_46, %c4, %c0_47, %c0_48], %120 {strides = array<i32>} : memref<2x8x8x8xf32, #tpu.memory_space<vmem>>, vector<2x1x8x8xf32>,
    %121 = arith.truncf %117 : vector<2x8x8xf32> to vector<2x8x8xbf16>
    %cst_49 = arith.constant dense<0.000000e+00> : vector<2x8x8xf32>
    %122 = tpu.matmul %121, %105, %cst_49 {dimension_numbers = #tpu.dot_dimension_numbers<[2], [1], [1], [2], [0, 0, 0, 1, 1, 2], [0], [0]>} : vector<2x8x8xbf16>, vector<2x8x8xbf16>, vector<2x8x8xf32> -> vector<2x8x8xf32>
    %123 = vector.extract_strided_slice %14 {offsets = [0, 0, 40], sizes = [2, 8, 8], strides = [1, 1, 1]} : vector<2x8x64xbf16> to vector<2x8x8xbf16>
    %124 = vector.extract_strided_slice %17 {offsets = [0, 0, 40], sizes = [2, 8, 8], strides = [1, 1, 1]} : vector<2x8x64xbf16> to vector<2x8x8xbf16>
    %125 = vector.extract_strided_slice %20 {offsets = [0, 0, 40], sizes = [2, 8, 8], strides = [1, 1, 1]} : vector<2x8x64xbf16> to vector<2x8x8xbf16>
    %cst_50 = arith.constant dense<0.000000e+00> : vector<2x8x8xf32>
    %126 = tpu.matmul %123, %124, %cst_50 {dimension_numbers = #tpu.dot_dimension_numbers<[2], [2], [1], [1], [0, 0, 0, 1, 1, 1], [0], [0]>} : vector<2x8x8xbf16>, vector<2x8x8xbf16>, vector<2x8x8xf32> -> vector<2x8x8xf32>
    %127 = arith.addf %126, %22 : vector<2x8x8xf32>
    %cst_51 = arith.constant dense<0xFF800000> : vector<2x8xf32>
    %128 = vector.multi_reduction <maximumf>, %127, %cst_51 [2] : vector<2x8x8xf32> to vector<2x8xf32>
    %129 = vector.shape_cast %128 : vector<2x8xf32> to vector<2x8x1xf32>
    %130 = vector.broadcast %129 : vector<2x8x1xf32> to vector<2x8x8xf32>
    %131 = arith.subf %127, %130 : vector<2x8x8xf32>
    %132 = math.exp %131 : vector<2x8x8xf32>
    %cst_52 = arith.constant dense<0.000000e+00> : vector<2x8xf32>
    %133 = vector.multi_reduction <add>, %132, %cst_52 [2] : vector<2x8x8xf32> to vector<2x8xf32>
    %134 = vector.shape_cast %133 : vector<2x8xf32> to vector<2x8x1xf32>
    %135 = tpu.reciprocal %134 {approx = true} : vector<2x8x1xf32> -> vector<2x8x1xf32>
    %136 = vector.broadcast %135 : vector<2x8x1xf32> to vector<2x8x8xf32>
    %137 = arith.mulf %132, %136 : vector<2x8x8xf32>
    %c0_53 = arith.constant 0 : index
    %c5 = arith.constant 5 : index
    %c0_54 = arith.constant 0 : index
    %c0_55 = arith.constant 0 : index
    %138 = vector.load %arg8[%c0_53, %c5, %c0_54, %c0_55] : memref<2x8x8x8xf32, #tpu.memory_space<vmem>>, vector<2x1x8x8xf32>
    %139 = vector.shape_cast %138 : vector<2x1x8x8xf32> to vector<2x8x8xf32>
    %140 = vector.shape_cast %137 : vector<2x8x8xf32> to vector<2x1x8x8xf32>
    tpu.vector_store %arg8[%c0_53, %c5, %c0_54, %c0_55], %140 {strides = array<i32>} : memref<2x8x8x8xf32, #tpu.memory_space<vmem>>, vector<2x1x8x8xf32>,
    %141 = arith.truncf %137 : vector<2x8x8xf32> to vector<2x8x8xbf16>
    %cst_56 = arith.constant dense<0.000000e+00> : vector<2x8x8xf32>
    %142 = tpu.matmul %141, %125, %cst_56 {dimension_numbers = #tpu.dot_dimension_numbers<[2], [1], [1], [2], [0, 0, 0, 1, 1, 2], [0], [0]>} : vector<2x8x8xbf16>, vector<2x8x8xbf16>, vector<2x8x8xf32> -> vector<2x8x8xf32>
    %143 = vector.extract_strided_slice %14 {offsets = [0, 0, 48], sizes = [2, 8, 8], strides = [1, 1, 1]} : vector<2x8x64xbf16> to vector<2x8x8xbf16>
    %144 = vector.extract_strided_slice %17 {offsets = [0, 0, 48], sizes = [2, 8, 8], strides = [1, 1, 1]} : vector<2x8x64xbf16> to vector<2x8x8xbf16>
    %145 = vector.extract_strided_slice %20 {offsets = [0, 0, 48], sizes = [2, 8, 8], strides = [1, 1, 1]} : vector<2x8x64xbf16> to vector<2x8x8xbf16>
    %cst_57 = arith.constant dense<0.000000e+00> : vector<2x8x8xf32>
    %146 = tpu.matmul %143, %144, %cst_57 {dimension_numbers = #tpu.dot_dimension_numbers<[2], [2], [1], [1], [0, 0, 0, 1, 1, 1], [0], [0]>} : vector<2x8x8xbf16>, vector<2x8x8xbf16>, vector<2x8x8xf32> -> vector<2x8x8xf32>
    %147 = arith.addf %146, %22 : vector<2x8x8xf32>
    %cst_58 = arith.constant dense<0xFF800000> : vector<2x8xf32>
    %148 = vector.multi_reduction <maximumf>, %147, %cst_58 [2] : vector<2x8x8xf32> to vector<2x8xf32>
    %149 = vector.shape_cast %148 : vector<2x8xf32> to vector<2x8x1xf32>
    %150 = vector.broadcast %149 : vector<2x8x1xf32> to vector<2x8x8xf32>
    %151 = arith.subf %147, %150 : vector<2x8x8xf32>
    %152 = math.exp %151 : vector<2x8x8xf32>
    %cst_59 = arith.constant dense<0.000000e+00> : vector<2x8xf32>
    %153 = vector.multi_reduction <add>, %152, %cst_59 [2] : vector<2x8x8xf32> to vector<2x8xf32>
    %154 = vector.shape_cast %153 : vector<2x8xf32> to vector<2x8x1xf32>
    %155 = tpu.reciprocal %154 {approx = true} : vector<2x8x1xf32> -> vector<2x8x1xf32>
    %156 = vector.broadcast %155 : vector<2x8x1xf32> to vector<2x8x8xf32>
    %157 = arith.mulf %152, %156 : vector<2x8x8xf32>
    %c0_60 = arith.constant 0 : index
    %c6 = arith.constant 6 : index
    %c0_61 = arith.constant 0 : index
    %c0_62 = arith.constant 0 : index
    %158 = vector.load %arg8[%c0_60, %c6, %c0_61, %c0_62] : memref<2x8x8x8xf32, #tpu.memory_space<vmem>>, vector<2x1x8x8xf32>
    %159 = vector.shape_cast %158 : vector<2x1x8x8xf32> to vector<2x8x8xf32>
    %160 = vector.shape_cast %157 : vector<2x8x8xf32> to vector<2x1x8x8xf32>
    tpu.vector_store %arg8[%c0_60, %c6, %c0_61, %c0_62], %160 {strides = array<i32>} : memref<2x8x8x8xf32, #tpu.memory_space<vmem>>, vector<2x1x8x8xf32>,
    %161 = arith.truncf %157 : vector<2x8x8xf32> to vector<2x8x8xbf16>
    %cst_63 = arith.constant dense<0.000000e+00> : vector<2x8x8xf32>
    %162 = tpu.matmul %161, %145, %cst_63 {dimension_numbers = #tpu.dot_dimension_numbers<[2], [1], [1], [2], [0, 0, 0, 1, 1, 2], [0], [0]>} : vector<2x8x8xbf16>, vector<2x8x8xbf16>, vector<2x8x8xf32> -> vector<2x8x8xf32>
    %163 = vector.extract_strided_slice %14 {offsets = [0, 0, 56], sizes = [2, 8, 8], strides = [1, 1, 1]} : vector<2x8x64xbf16> to vector<2x8x8xbf16>
    %164 = vector.extract_strided_slice %17 {offsets = [0, 0, 56], sizes = [2, 8, 8], strides = [1, 1, 1]} : vector<2x8x64xbf16> to vector<2x8x8xbf16>
    %165 = vector.extract_strided_slice %20 {offsets = [0, 0, 56], sizes = [2, 8, 8], strides = [1, 1, 1]} : vector<2x8x64xbf16> to vector<2x8x8xbf16>
    %cst_64 = arith.constant dense<0.000000e+00> : vector<2x8x8xf32>
    %166 = tpu.matmul %163, %164, %cst_64 {dimension_numbers = #tpu.dot_dimension_numbers<[2], [2], [1], [1], [0, 0, 0, 1, 1, 1], [0], [0]>} : vector<2x8x8xbf16>, vector<2x8x8xbf16>, vector<2x8x8xf32> -> vector<2x8x8xf32>
    %167 = arith.addf %166, %22 : vector<2x8x8xf32>
    %cst_65 = arith.constant dense<0xFF800000> : vector<2x8xf32>
    %168 = vector.multi_reduction <maximumf>, %167, %cst_65 [2] : vector<2x8x8xf32> to vector<2x8xf32>
    %169 = vector.shape_cast %168 : vector<2x8xf32> to vector<2x8x1xf32>
    %170 = vector.broadcast %169 : vector<2x8x1xf32> to vector<2x8x8xf32>
    %171 = arith.subf %167, %170 : vector<2x8x8xf32>
    %172 = math.exp %171 : vector<2x8x8xf32>
    %cst_66 = arith.constant dense<0.000000e+00> : vector<2x8xf32>
    %173 = vector.multi_reduction <add>, %172, %cst_66 [2] : vector<2x8x8xf32> to vector<2x8xf32>
    %174 = vector.shape_cast %173 : vector<2x8xf32> to vector<2x8x1xf32>
    %175 = tpu.reciprocal %174 {approx = true} : vector<2x8x1xf32> -> vector<2x8x1xf32>
    %176 = vector.broadcast %175 : vector<2x8x1xf32> to vector<2x8x8xf32>
    %177 = arith.mulf %172, %176 : vector<2x8x8xf32>
    %c0_67 = arith.constant 0 : index
    %c7 = arith.constant 7 : index
    %c0_68 = arith.constant 0 : index
    %c0_69 = arith.constant 0 : index
    %178 = vector.load %arg8[%c0_67, %c7, %c0_68, %c0_69] : memref<2x8x8x8xf32, #tpu.memory_space<vmem>>, vector<2x1x8x8xf32>
    %179 = vector.shape_cast %178 : vector<2x1x8x8xf32> to vector<2x8x8xf32>
    %180 = vector.shape_cast %177 : vector<2x8x8xf32> to vector<2x1x8x8xf32>
    tpu.vector_store %arg8[%c0_67, %c7, %c0_68, %c0_69], %180 {strides = array<i32>} : memref<2x8x8x8xf32, #tpu.memory_space<vmem>>, vector<2x1x8x8xf32>,
    %181 = arith.truncf %177 : vector<2x8x8xf32> to vector<2x8x8xbf16>
    %cst_70 = arith.constant dense<0.000000e+00> : vector<2x8x8xf32>
    %182 = tpu.matmul %181, %165, %cst_70 {dimension_numbers = #tpu.dot_dimension_numbers<[2], [1], [1], [2], [0, 0, 0, 1, 1, 2], [0], [0]>} : vector<2x8x8xbf16>, vector<2x8x8xbf16>, vector<2x8x8xf32> -> vector<2x8x8xf32>
    %183 = tpu.concatenate %42, %62, %82, %102, %122, %142, %162, %182 in 2 : vector<2x8x8xf32>, vector<2x8x8xf32>, vector<2x8x8xf32>, vector<2x8x8xf32>, vector<2x8x8xf32>, vector<2x8x8xf32>, vector<2x8x8xf32>, vector<2x8x8xf32> -> vector<2x8x64xf32>
    %184 = vector.shape_cast %183 : vector<2x8x64xf32> to vector<16x64xf32>
    %185 = arith.truncf %184 : vector<16x64xf32> to vector<16x64xbf16>
    %c0_71 = arith.constant 0 : index
    %c0_72 = arith.constant 0 : index
    %186 = vector.load %arg6[%c0_71, %c0_72] : memref<64x512xbf16, #tpu.memory_space<vmem>>, vector<64x512xbf16>
    %cst_73 = arith.constant dense<0.000000e+00> : vector<16x512xf32>
    %187 = tpu.matmul %185, %186, %cst_73 {dimension_numbers = #tpu.dot_dimension_numbers<[1], [0], [0], [1], [0, 0, 1, 1], [], []>} : vector<16x64xbf16>, vector<64x512xbf16>, vector<16x512xf32> -> vector<16x512xf32>
    %188 = arith.addf %187, %1 : vector<16x512xf32>
    %cst_74 = arith.constant dense<0.000000e+00> : vector<16xf32>
    %189 = vector.multi_reduction <add>, %188, %cst_74 [1] : vector<16x512xf32> to vector<16xf32>
    %190 = vector.shape_cast %189 : vector<16xf32> to vector<16x1xf32>
    %191 = arith.mulf %188, %188 : vector<16x512xf32>
    %cst_75 = arith.constant dense<0.000000e+00> : vector<16xf32>
    %192 = vector.multi_reduction <add>, %191, %cst_75 [1] : vector<16x512xf32> to vector<16xf32>
    %193 = vector.shape_cast %192 : vector<16xf32> to vector<16x1xf32>
    %cst_76 = arith.constant 0.001953125 : f32
    %194 = vector.broadcast %cst_76 : f32 to vector<16x1xf32>
    %195 = arith.mulf %190, %194 : vector<16x1xf32>
    %cst_77 = arith.constant 0.001953125 : f32
    %196 = vector.broadcast %cst_77 : f32 to vector<16x1xf32>
    %197 = arith.mulf %193, %196 : vector<16x1xf32>
    %198 = arith.mulf %195, %195 : vector<16x1xf32>
    %199 = arith.subf %197, %198 : vector<16x1xf32>
    %200 = vector.broadcast %195 : vector<16x1xf32> to vector<16x512xf32>
    %201 = arith.subf %188, %200 : vector<16x512xf32>
    %cst_78 = arith.constant 9.99999974E-6 : f32
    %202 = vector.broadcast %cst_78 : f32 to vector<16x1xf32>
    %203 = arith.addf %199, %202 : vector<16x1xf32>
    %204 = math.rsqrt %203 : vector<16x1xf32>
    %205 = vector.broadcast %204 : vector<16x1xf32> to vector<16x512xf32>
    %206 = arith.mulf %201, %205 : vector<16x512xf32>
    %207 = vector.shape_cast %206 : vector<16x512xf32> to vector<2x8x512xf32>
    %c0_79 = arith.constant 0 : index
    %c0_80 = arith.constant 0 : index
    %c0_81 = arith.constant 0 : index
    %208 = vector.load %arg7[%c0_79, %c0_80, %c0_81] : memref<2x8x512xf32, #tpu.memory_space<vmem>>, vector<2x8x512xf32>
    tpu.vector_store %arg7[%c0_79, %c0_80, %c0_81], %207 {strides = array<i32>} : memref<2x8x512xf32, #tpu.memory_space<vmem>>, vector<2x8x512xf32>,
    return
  }
  func.func @transform_0(%arg0: i32) -> (i32, i32, i32) {
    %c0_i32 = arith.constant 0 : i32
    %c0_i32_0 = arith.constant 0 : i32
    %c0_i32_1 = arith.constant 0 : i32
    return %arg0, %c0_i32, %c0_i32_0 : i32, i32, i32
  }
  func.func @transform_1(%arg0: i32) -> (i32, i32, i32) {
    %c0_i32 = arith.constant 0 : i32
    %c0_i32_0 = arith.constant 0 : i32
    %c0_i32_1 = arith.constant 0 : i32
    return %arg0, %c0_i32, %c0_i32_0 : i32, i32, i32
  }
  func.func @transform_2(%arg0: i32) -> (i32, i32, i32) {
    %c0_i32 = arith.constant 0 : i32
    %c0_i32_0 = arith.constant 0 : i32
    %c0_i32_1 = arith.constant 0 : i32
    return %arg0, %c0_i32, %c0_i32_0 : i32, i32, i32
  }
  func.func @transform_3(%arg0: i32) -> (i32, i32, i32) {
    %c0_i32 = arith.constant 0 : i32
    %c0_i32_0 = arith.constant 0 : i32
    %c0_i32_1 = arith.constant 0 : i32
    return %arg0, %c0_i32, %c0_i32_0 : i32, i32, i32
  }
  func.func @transform_4(%arg0: i32) -> (i32, i32) {
    %c0_i32 = arith.constant 0 : i32
    %c0_i32_0 = arith.constant 0 : i32
    %c0_i32_1 = arith.constant 0 : i32
    return %c0_i32, %c0_i32_0 : i32, i32
  }
  func.func @transform_5(%arg0: i32) -> (i32, i32) {
    %c0_i32 = arith.constant 0 : i32
    %c0_i32_0 = arith.constant 0 : i32
    %c0_i32_1 = arith.constant 0 : i32
    return %c0_i32, %c0_i32_0 : i32, i32
  }
  func.func @transform_6(%arg0: i32) -> (i32, i32, i32) {
    %c0_i32 = arith.constant 0 : i32
    %c0_i32_0 = arith.constant 0 : i32
    %c0_i32_1 = arith.constant 0 : i32
    return %arg0, %c0_i32, %c0_i32_0 : i32, i32, i32
  }
  func.func @transform_7(%arg0: i32) -> (i32, i32, i32, i32) {
    %c0_i32 = arith.constant 0 : i32
    %c0_i32_0 = arith.constant 0 : i32
    %c0_i32_1 = arith.constant 0 : i32
    %c0_i32_2 = arith.constant 0 : i32
    return %arg0, %c0_i32, %c0_i32_0, %c0_i32_1 : i32, i32, i32, i32
  }
}

</mosaic_0001>

<bundles_post_ra>
// kernel: multi_head_attention.1
= control target key start
LH: loop header
LB: loop body
LE: loop exit
PB: predicated region body
PF: predicated region fallthrough
CT: control target
= control target key end

     0   :  { %13 = vsyncpa [#allocation3], 0  ;;  %s4290_s0 = inlined_call_operand.vmem [shape: f32[2,8,512], index: 0, kind: input, shape index: {}]   ;;  %s4291_s1 = inlined_call_operand.vmem [shape: f32[2,8,512], index: 1, kind: input, shape index: {}]   ;;  %s4292_s2 = inlined_call_operand.vmem [shape: f32[2,8,512], index: 2, kind: input, shape index: {}]   ;;  %s4293_s3 = inlined_call_operand.vmem [shape: bf16[2,8,8], index: 3, kind: input, shape index: {}]   ;;  %s4294_s4 = inlined_call_operand.vmem [shape: bf16[512,192], index: 4, kind: input, shape index: {}]   ;;  %s4295_s5 = inlined_call_operand.vmem [shape: bf16[64,512], index: 5, kind: input, shape index: {}]   ;;  %s4296_s6 = inlined_call_operand.hbm [shape: f32[2,8,512], index: 6, kind: output, shape index: {0}]   ;;  %s4297_s7 = inlined_call_operand.hbm [shape: f32[2,8,8,8], index: 7, kind: output, shape index: {1}]  }
   0x1   :  { %v3177_v0 = vld [vmem:[%s4294_s4 + $0x4] ss:$8 sps:$4 sm:$0xff]   ;;  %v3179_v1 = vld [vmem:[%s4294_s4] ss:$8 sps:$4 sm:$0xff]   ;;  %v3180_v2 = vld [vmem:[%s4294_s4 + $0x14] ss:$8 sps:$4 sm:$0xff]  }
   0x2   :  { %448 = vmatprep.subr.bf16.mxu0 %v3177_v0  ;;  %v3182_v3 = vld [vmem:[%s4294_s4 + $0x10] ss:$8 sps:$4 sm:$0xff]   ;;  %v3183_v4 = vld [vmem:[%s4294_s4 + $0x24] ss:$8 sps:$4 sm:$0xff]   ;;  %v3185_v5 = vld [vmem:[%s4294_s4 + $0x20] ss:$8 sps:$4 sm:$0xff]  }
   0x3   :  { %449 = vmatpush1.bf16.msra.mxu0 %v3179_v1  ;;  %v3186_v6 = vld [vmem:[%s4294_s4 + $0x34] ss:$8 sps:$4 sm:$0xff]   ;;  %v3188_v7 = vld [vmem:[%s4294_s4 + $0x30] ss:$8 sps:$4 sm:$0xff]   ;;  %v3189_v8 = vld [vmem:[%s4294_s4 + $0x44] ss:$8 sps:$4 sm:$0xff]  }
   0x4   :  { %450 = vmatprep.subr.bf16.mxu0 %v3180_v2  ;;  %v3191_v9 = vld [vmem:[%s4294_s4 + $0x40] ss:$8 sps:$4 sm:$0xff]   ;;  %v3192_v10 = vld [vmem:[%s4294_s4 + $0x54] ss:$8 sps:$4 sm:$0xff]   ;;  %v3194_v11 = vld [vmem:[%s4294_s4 + $0x50] ss:$8 sps:$4 sm:$0xff]  }
   0x5   :  { %v3195_v12 = vld [vmem:[%s4294_s4 + $0x64] ss:$8 sps:$4 sm:$0xff]   ;;  %v3197_v16 = vld [vmem:[%s4294_s4 + $0x60] ss:$8 sps:$4 sm:$0xff]   ;;  %v3198_v17 = vld [vmem:[%s4294_s4 + $0x74] ss:$8 sps:$4 sm:$0xff]  }
   0x6   :  { %v29_v13 = vld [vmem:[%s4290_s0 + $0x8] sm:$0xff]  ;;  %v3200_v18 = vld [vmem:[%s4294_s4 + $0x70] ss:$8 sps:$4 sm:$0xff]   ;;  %v3204_v21 = vld [vmem:[%s4294_s4 + $0x94] ss:$8 sps:$4 sm:$0xff]  }
   0x7   :  { %451 = vmatpush1.bf16.msra.mxu0 %v3182_v3  ;;  %v33_v14 = vld [vmem:[%s4290_s0 + $0x28] sm:$0xff]  ;;  %v3206_v22 = vld [vmem:[%s4294_s4 + $0x90] ss:$8 sps:$4 sm:$0xff]   ;;  %v3210_v25 = vld [vmem:[%s4294_s4 + $0xb4] ss:$8 sps:$4 sm:$0xff]  }
   0x8   :  { %452 = vmatprep.subr.bf16.mxu0 %v3183_v4  ;;  %v53_v15 = vpack.c.bf16 %v33_v14, %v29_v13  ;;  %v3201_v19 = vld [vmem:[%s4294_s4 + $0x84] ss:$8 sps:$4 sm:$0xff]   ;;  %v3203_v20 = vld [vmem:[%s4294_s4 + $0x80] ss:$8 sps:$4 sm:$0xff]   ;;  %v3212_v26 = vld [vmem:[%s4294_s4 + $0xb0] ss:$8 sps:$4 sm:$0xff]  }
   0x9   :  { %v3207_v23 = vld [vmem:[%s4294_s4 + $0xa4] ss:$8 sps:$4 sm:$0xff]   ;;  %v3209_v24 = vld [vmem:[%s4294_s4 + $0xa0] ss:$8 sps:$4 sm:$0xff]   ;;  %v3216_v29 = vld [vmem:[%s4294_s4 + $0xd4] ss:$8 sps:$4 sm:$0xff]  }
   0xa   :  { %480 = vmatprep.mubr.bf16.mxu0 %v53_v15  ;;  %v3213_v27 = vld [vmem:[%s4294_s4 + $0xc4] ss:$8 sps:$4 sm:$0xff]   ;;  %v3215_v28 = vld [vmem:[%s4294_s4 + $0xc0] ss:$8 sps:$4 sm:$0xff]   ;;  %v3218_v30 = vld [vmem:[%s4294_s4 + $0xd0] ss:$8 sps:$4 sm:$0xff]  }
   0xb   :  { %453 = vmatpush1.bf16.msra.mxu0 %v3185_v5  ;;  %v3219_v31 = vld [vmem:[%s4294_s4 + $0xe4] ss:$8 sps:$4 sm:$0xff]   ;;  %v3221_v32 = vld [vmem:[%s4294_s4 + $0xe0] ss:$8 sps:$4 sm:$0xff]   ;;  %v3222_v33 = vld [vmem:[%s4294_s4 + $0xf4] ss:$8 sps:$4 sm:$0xff]  }
   0xc   :  { %454 = vmatprep.subr.bf16.mxu0 %v3186_v6 }
   0xf   :  { %455 = vmatpush1.bf16.msra.mxu0 %v3188_v7 }
  0x10   :  { %456 = vmatprep.subr.bf16.mxu0 %v3189_v8 }
  0x13   :  { %457 = vmatpush1.bf16.msra.mxu0 %v3191_v9 }
  0x14   :  { %458 = vmatprep.subr.bf16.mxu0 %v3192_v10 }
  0x17   :  { %459 = vmatpush1.bf16.msra.mxu0 %v3194_v11 }
  0x18   :  { %460 = vmatprep.subr.bf16.mxu0 %v3195_v12 }
  0x1b   :  { %461 = vmatpush1.bf16.msra.mxu0 %v3197_v16 }
  0x1c   :  { %462 = vmatprep.subr.bf16.mxu0 %v3198_v17 }
  0x1f   :  { %463 = vmatpush1.bf16.msra.mxu0 %v3200_v18 }
  0x20   :  { %464 = vmatprep.subr.bf16.mxu0 %v3201_v19 }
  0x23   :  { %465 = vmatpush1.bf16.msra.mxu0 %v3203_v20 }
  0x24   :  { %466 = vmatprep.subr.bf16.mxu0 %v3204_v21 }
  0x27   :  { %467 = vmatpush1.bf16.msra.mxu0 %v3206_v22 }
  0x28   :  { %468 = vmatprep.subr.bf16.mxu0 %v3207_v23 }
  0x2b   :  { %469 = vmatpush1.bf16.msra.mxu0 %v3209_v24 }
  0x2c   :  { %470 = vmatprep.subr.bf16.mxu0 %v3210_v25 }
  0x2f   :  { %471 = vmatpush1.bf16.msra.mxu0 %v3212_v26 }
  0x30   :  { %472 = vmatprep.subr.bf16.mxu0 %v3213_v27 }
  0x33   :  { %473 = vmatpush1.bf16.msra.mxu0 %v3215_v28 }
  0x34   :  { %474 = vmatprep.subr.bf16.mxu0 %v3216_v29 }
  0x37   :  { %475 = vmatpush1.bf16.msra.mxu0 %v3218_v30 }
  0x38   :  { %476 = vmatprep.subr.bf16.mxu0 %v3219_v31 }
  0x39   :  { %14 = vsyncpa [#allocation5], 0  ;;  %v3224_v34 = vld [vmem:[%s4294_s4 + $0xf0] ss:$8 sps:$4 sm:$0xff]   ;;  %v28_v35 = vld [vmem:[%s4290_s0] sm:$0xff]  ;;  %vm3422_vm0 = vmmov 0  }
  0x3a   :  { %v32_v36 = vld [vmem:[%s4290_s0 + $0x20] sm:$0xff]  ;;  %v37_v38 = vld [vmem:[%s4291_s1 + $0x8] sm:$0xff]  ;;  %v3230_v43 = vld [vmem:[%s4294_s4 + $0x114] ss:$8 sps:$4 sm:$0xff]   ;;  %vm587_vm1 = vcmask 64512   ;;  %vm712_vm2 = vcmask 1043456  }
  0x3b   :  { %477 = vmatpush1.bf16.msra.mxu0 %v3221_v32  ;;  %v3227_v37 = vld [vmem:[%s4294_s4 + $0x104] ss:$8 sps:$4 sm:$0xff]   ;;  %v52_v40 = vpack.c.bf16 %v32_v36, %v28_v35  ;;  %v3225_v41 = vld [vmem:[%s4294_s4 + $0x100] ss:$8 sps:$4 sm:$0xff]   ;;  %v3228_v44 = vld [vmem:[%s4294_s4 + $0x110] ss:$8 sps:$4 sm:$0xff]  }
  0x3c   :  { %478 = vmatprep.subr.bf16.mxu0 %v3222_v33  ;;  %v41_v39 = vld [vmem:[%s4291_s1 + $0x28] sm:$0xff]  ;;  %v36_v45 = vld [vmem:[%s4291_s1] sm:$0xff]  ;;  %v3236_v53 = vld [vmem:[%s4294_s4 + $0x134] ss:$8 sps:$4 sm:$0xff]   ;;  %v3421_v36 = vmov 0.0   ;;  %s3425_s16 = smov 120  }
  0x3d   :  { %v57_v42 = vpack.c.bf16 %v41_v39, %v37_v38  ;;  %v40_v46 = vld [vmem:[%s4291_s1 + $0x20] sm:$0xff]  ;;  %v45_v48 = vld [vmem:[%s4292_s2 + $0x8] sm:$0xff]  ;;  %v3234_v54 = vld [vmem:[%s4294_s4 + $0x130] ss:$8 sps:$4 sm:$0xff]   ;;  %2916 = vmatprep.subr.bf16.mxu1 %v3421_v36  ;;  %2918 = vmatprep.mubr.msk.bf16.mxu1 %vm3422_vm0, %v3421_v36  ;;  %s3426_s17 = smov 112   ;;  %s3427_s18 = smov 48  }
  0x3e   :  { %v3233_v47 = vld [vmem:[%s4294_s4 + $0x124] ss:$8 sps:$4 sm:$0xff]   ;;  %v56_v50 = vpack.c.bf16 %v40_v46, %v36_v45  ;;  %v3231_v51 = vld [vmem:[%s4294_s4 + $0x120] ss:$8 sps:$4 sm:$0xff]   ;;  %v31_v58 = vld [vmem:[%s4290_s0 + $0x18] sm:$0xff]  ;;  %s3428_s19 = smov 40  }
  0x3f   :  { %479 = vmatpush1.bf16.msra.mxu0 %v3224_v34  ;;  %v49_v49 = vld [vmem:[%s4292_s2 + $0x28] sm:$0xff]  ;;  %v44_v55 = vld [vmem:[%s4292_s2] sm:$0xff]  ;;  %v35_v59 = vld [vmem:[%s4290_s0 + $0x38] sm:$0xff]  ;;  %s3429_s20 = smov 104   ;;  %s3430_s21 = smov 32   ;;  %vm2421_vm3 = vcmask 130048  }
  0x40   :  { %505 = vmatprep.subr.bf16.mxu0 %v3227_v37  ;;  %v61_v52 = vpack.c.bf16 %v49_v49, %v45_v48  ;;  %v48_v56 = vld [vmem:[%s4292_s2 + $0x20] sm:$0xff]  ;;  %v55_v62 = vpack.c.bf16 %v35_v59, %v31_v58  ;;  %v3242_v63 = vld [vmem:[%s4294_s4 + $0x154] ss:$8 sps:$4 sm:$0xff]   ;;  %v3240_v0 = vld [vmem:[%s4294_s4 + $0x150] ss:$8 sps:$4 sm:$0xff]   ;;  %s3431_s22 = smov 96  }
  0x41   :  { %v3239_v57 = vld [vmem:[%s4294_s4 + $0x144] ss:$8 sps:$4 sm:$0xff]   ;;  %v60_v60 = vpack.c.bf16 %v48_v56, %v44_v55  ;;  %v3237_v61 = vld [vmem:[%s4294_s4 + $0x140] ss:$8 sps:$4 sm:$0xff]   ;;  %v3248_v3 = vld [vmem:[%s4294_s4 + $0x174] ss:$8 sps:$4 sm:$0xff]  }
  0x42   :  { %481 = vmatmul.mubr.bf16.vlgmr.msra.gmra.mrb[0].mxu0 %v52_v40  ;;  %v3245_v1 = vld [vmem:[%s4294_s4 + $0x164] ss:$8 sps:$4 sm:$0xff]   ;;  %v3243_v2 = vld [vmem:[%s4294_s4 + $0x160] ss:$8 sps:$4 sm:$0xff]   ;;  %v3246_v4 = vld [vmem:[%s4294_s4 + $0x170] ss:$8 sps:$4 sm:$0xff]  }
  0x43   :  { %506 = vmatpush1.bf16.msra.mxu0 %v3225_v41  ;;  %488 = vmatprep.mubr.bf16.mxu0 %v57_v42  ;;  %v3251_v5 = vld [vmem:[%s4294_s4 + $0x184] ss:$8 sps:$4 sm:$0xff]   ;;  %v3249_v6 = vld [vmem:[%s4294_s4 + $0x180] ss:$8 sps:$4 sm:$0xff]   ;;  %v3254_v7 = vld [vmem:[%s4294_s4 + $0x194] ss:$8 sps:$4 sm:$0xff]  }
  0x44   :  { %507 = vmatprep.subr.bf16.mxu0 %v3230_v43  ;;  %v3252_v8 = vld [vmem:[%s4294_s4 + $0x190] ss:$8 sps:$4 sm:$0xff]   ;;  %v3257_v9 = vld [vmem:[%s4294_s4 + $0x1a4] ss:$8 sps:$4 sm:$0xff]   ;;  %v3255_v10 = vld [vmem:[%s4294_s4 + $0x1a0] ss:$8 sps:$4 sm:$0xff]  }
  0x45   :  { %v3260_v11 = vld [vmem:[%s4294_s4 + $0x1b4] ss:$8 sps:$4 sm:$0xff]   ;;  %v3258_v12 = vld [vmem:[%s4294_s4 + $0x1b0] ss:$8 sps:$4 sm:$0xff]   ;;  %v3263_v13 = vld [vmem:[%s4294_s4 + $0x1c4] ss:$8 sps:$4 sm:$0xff]  }
  0x46   :  { %v3261_v14 = vld [vmem:[%s4294_s4 + $0x1c0] ss:$8 sps:$4 sm:$0xff]   ;;  %v3266_v15 = vld [vmem:[%s4294_s4 + $0x1d4] ss:$8 sps:$4 sm:$0xff]   ;;  %v3264_v16 = vld [vmem:[%s4294_s4 + $0x1d0] ss:$8 sps:$4 sm:$0xff]  }
  0x47   :  { %508 = vmatpush1.bf16.msra.mxu0 %v3228_v44  ;;  %v3269_v17 = vld [vmem:[%s4294_s4 + $0x1e4] ss:$8 sps:$4 sm:$0xff]   ;;  %v3267_v18 = vld [vmem:[%s4294_s4 + $0x1e0] ss:$8 sps:$4 sm:$0xff]   ;;  %v3272_v19 = vld [vmem:[%s4294_s4 + $0x1f4] ss:$8 sps:$4 sm:$0xff]  }
  0x48   :  { %509 = vmatprep.subr.bf16.mxu0 %v3233_v47  ;;  %v3270_v20 = vld [vmem:[%s4294_s4 + $0x1f0] ss:$8 sps:$4 sm:$0xff]   ;;  %s3432_s23 = smov 24   ;;  %s3433_s24 = smov 88   ;;  %vm2424_vm4 = vcmask 195584   ;;  %vm2427_vm5 = vcmask 261120  }
  0x49   :  { %v30_v21 = vld [vmem:[%s4290_s0 + $0x10] sm:$0xff]  ;;  %v39_v23 = vld [vmem:[%s4291_s1 + $0x18] sm:$0xff]  ;;  %s3434_s25 = smov 16   ;;  %s3435_s26 = smov 80   ;;  %vm2430_vm6 = vcmask 326656   ;;  %vm2433_vm7 = vcmask 392192  }
  0x4a   :  { %489 = vmatmul.mubr.bf16.gmra.mrb[4].mxu0 %v56_v50  ;;  %v34_v22 = vld [vmem:[%s4290_s0 + $0x30] sm:$0xff]  ;;  %v43_v24 = vld [vmem:[%s4291_s1 + $0x38] sm:$0xff]  ;;  %s3436_s4 = smov 8   ;;  %s3437_s27 = smov 72   ;;  %vm2436_vm8 = vcmask 457728   ;;  %vm2536_vm9 = vcmask 523264  }
  0x4b   :  { %510 = vmatpush1.bf16.msra.mxu0 %v3231_v51  ;;  %496 = vmatprep.mubr.bf16.mxu0 %v61_v52  ;;  %v54_v25 = vpack.c.bf16 %v34_v22, %v30_v21  ;;  %v59_v26 = vpack.c.bf16 %v43_v24, %v39_v23  ;;  %v38_v27 = vld [vmem:[%s4291_s1 + $0x10] sm:$0xff]  ;;  %v47_v29 = vld [vmem:[%s4292_s2 + $0x18] sm:$0xff] }
  0x4c   :  { %511 = vmatprep.subr.bf16.mxu0 %v3236_v53  ;;  %v42_v28 = vld [vmem:[%s4291_s1 + $0x30] sm:$0xff]  ;;  %v51_v30 = vld [vmem:[%s4292_s2 + $0x38] sm:$0xff]  ;;  %s3423_s1 = smov 64  }
  0x4d   :  { %v58_v31 = vpack.c.bf16 %v42_v28, %v38_v27  ;;  %v63_v32 = vpack.c.bf16 %v51_v30, %v47_v29  ;;  %v46_v33 = vld [vmem:[%s4292_s2 + $0x10] sm:$0xff] }
  0x4e   :  { %v50_v34 = vld [vmem:[%s4292_s2 + $0x30] sm:$0xff] }
  0x4f   :  { %512 = vmatpush1.bf16.msra.mxu0 %v3234_v54  ;;  %v62_v35 = vpack.c.bf16 %v50_v34, %v46_v33 }
  0x50   :  { %513 = vmatprep.subr.bf16.mxu0 %v3239_v57 }
  0x52   :  { %497 = vmatmul.mubr.bf16.gmra.mrb[8].mxu0 %v60_v60 }
  0x53   :  { %514 = vmatpush1.bf16.msra.mxu0 %v3237_v61  ;;  %537 = vmatprep.mubr.bf16.mxu0 %v55_v62  ;;  %v2849_v61 = vld [vmem:[%s4293_s3] sm:$0xff]   ;;  %s3424_s3 = smov 56  }
  0x54   :  { %515 = vmatprep.subr.bf16.mxu0 %v3242_v63  ;;  %v3785_v62 = vunpack.c.l.bf16 %v2849_v61 }
  0x57   :  { %516 = vmatpush1.bf16.msra.mxu0 %v3240_v0 }
  0x58   :  { %517 = vmatprep.subr.bf16.mxu0 %v3245_v1 }
  0x5b   :  { %518 = vmatpush1.bf16.msra.mxu0 %v3243_v2 }
  0x5c   :  { %519 = vmatprep.subr.bf16.mxu0 %v3248_v3 }
  0x5f   :  { %520 = vmatpush1.bf16.msra.mxu0 %v3246_v4 }
  0x60   :  { %521 = vmatprep.subr.bf16.mxu0 %v3251_v5  ;;  %v3789_v5 = vunpack.c.h.bf16 %v2849_v61 }
  0x63   :  { %522 = vmatpush1.bf16.msra.mxu0 %v3249_v6 }
  0x64   :  { %523 = vmatprep.subr.bf16.mxu0 %v3254_v7 }
  0x67   :  { %524 = vmatpush1.bf16.msra.mxu0 %v3252_v8 }
  0x68   :  { %525 = vmatprep.subr.bf16.mxu0 %v3257_v9 }
  0x6b   :  { %526 = vmatpush1.bf16.msra.mxu0 %v3255_v10 }
  0x6c   :  { %527 = vmatprep.subr.bf16.mxu0 %v3260_v11 }
  0x6f   :  { %528 = vmatpush1.bf16.msra.mxu0 %v3258_v12 }
  0x70   :  { %529 = vmatprep.subr.bf16.mxu0 %v3263_v13 }
  0x73   :  { %530 = vmatpush1.bf16.msra.mxu0 %v3261_v14 }
  0x74   :  { %531 = vmatprep.subr.bf16.mxu0 %v3266_v15 }
  0x77   :  { %532 = vmatpush1.bf16.msra.mxu0 %v3264_v16 }
  0x78   :  { %533 = vmatprep.subr.bf16.mxu0 %v3269_v17 }
  0x7b   :  { %534 = vmatpush1.bf16.msra.mxu0 %v3267_v18 }
  0x7c   :  { %535 = vmatprep.subr.bf16.mxu0 %v3272_v19 }
  0x7f   :  { %536 = vmatpush1.bf16.msra.mxu0 %v3270_v20 }
  0x80   :  { %3024 = vmatprep.subr.bf16.mxu0 %v3421_v36 }
  0x82   :  { %538 = vmatmul.mubr.bf16.vlgmr.msra.gmra.mrb[0].mxu0 %v54_v25 }
  0x83   :  { %545 = vmatprep.mubr.bf16.mxu0 %v59_v26 }
  0x8a   :  { %546 = vmatmul.mubr.bf16.gmra.mrb[4].mxu0 %v58_v31 }
  0x8b   :  { %553 = vmatprep.mubr.bf16.mxu0 %v63_v32 }
  0x92   :  { %554 = vmatmul.mubr.bf16.gmra.mrb[8].mxu0 %v62_v35 }
  0x93   :  { %3026 = vmatprep.mubr.msk.bf16.mxu0 %vm3422_vm0, %v3421_v36 }
 0x155   :  { %v539_v37 = vpop.f32.mrb[0].mxu0 }
 0x156   :  { %v541_v38 = vpop.f32.mrb[1].mxu0  ;;  %v562_v53 = vmul.f32 0.35355338, %v539_v37 }
 0x157   :  { %v542_v39 = vpop.f32.mrb[2].mxu0 }
 0x158   :  { %v544_v40 = vpop.f32.mrb[3].mxu0  ;;  %v3763_v55 = vpack.c.bf16 %v562_v53, %v562_v53  ;;  %v563_v57 = vmul.f32 0.35355338, %v542_v39 }
 0x15a   :  { %v3773_v59 = vpack.c.bf16 %v563_v57, %v563_v57 }
 0x15d   :  { %v547_v41 = vpop.f32.mrb[4].mxu0 }
 0x15e   :  { %v3753_v42 = vpack.c.bf16 %v547_v41, %v547_v41  ;;  %v549_v43 = vpop.f32.mrb[5].mxu0 }
 0x15f   :  { %v550_v44 = vpop.f32.mrb[6].mxu0 }
 0x160   :  { %585 = vrot.lane.b32.xlu0 %v3753_v42, %s3423_s1  ;;  %v552_v45 = vpop.f32.mrb[7].mxu0  ;;  %v3756_v46 = vpack.c.bf16 %v550_v44, %v550_v44 }
 0x164   :  { %635 = vrot.lane.b32.xlu0 %v3756_v46, %s3423_s1 }
 0x165   :  { %v555_v47 = vpop.f32.mrb[8].mxu0 }
 0x166   :  { %v556_v48 = vpop.f32.mrb[9].mxu0 }
 0x167   :  { %v558_v49 = vpop.f32.mrb[10].mxu0  ;;  %v3771_v58 = vpack.c.bf16 %v556_v48, %v556_v48 }
 0x168   :  { %v3759_v50 = vpop.f32.mrb[11].mxu0 }
 0x169   :  { %v714_v60 = vsel %vm712_vm2, %v3771_v58, 0  ;;  %v3805_v26 = vpack.c.bf16 %v3759_v50, %v3759_v50 }
 0x16b   :  { %v760_v29 = vsel %vm712_vm2, %v3805_v26, 0 }
 0x1d2   :  { %v586_v51 = vpop.permute.xlu0 %585 }
 0x1d3   :  { %v592_v52 = vsel %vm587_vm1, %v586_v51, 0 }
 0x1d4   :  { %2917 = vmatpush3.bf16.xpose.msra.mxu1 %v592_v52 }
 0x1d5   :  { %2922 = vmatprep.subr.bf16.mxu1 %v3421_v36 }
 0x1d6   :  { %v636_v54 = vpop.permute.xlu0 %635 }
 0x1d7   :  { %v641_v56 = vsel %vm587_vm1, %v636_v54, 0 }
 0x1db   :  { %2919 = vmatmul.mubr.msk.bf16.vlgmr.msra.gmra.mrb[0].mxu1 %vm587_vm1, %v3763_v55 }
 0x1dc   :  { %2923 = vmatpush3.bf16.xpose.msra.mxu1 %v641_v56  ;;  %2924 = vmatprep.mubr.msk.bf16.mxu1 %vm3422_vm0, %v3421_v36 }
 0x1dd   :  { %2928 = vmatprep.subr.bf16.mxu1 %v3421_v36 }
 0x1e3   :  { %2925 = vmatmul.mubr.msk.bf16.vlgmr.msra.gmra.mrb[4].mxu1 %vm587_vm1, %v3773_v59 }
 0x1e4   :  { %2929 = vmatpush3.bf16.msra.mxu1 %v714_v60  ;;  %2930 = vmatprep.mubr.msk.bf16.mxu1 %vm3422_vm0, %v3421_v36 }
 0x1e5   :  { %2934 = vmatprep.subr.bf16.mxu1 %v3421_v36 }
 0x2ae   :  { %v628_v63 = vpop.f32.mrb[0].mxu1 }
 0x2af   :  { %v629_v0 = vadd.f32 %v3785_v62, %v628_v63  ;;  %v2920_v1 = vpop.f32.mrb[1].mxu1 }
 0x2b0   :  { %v631_v2 = vpop.f32.mrb[2].mxu1 }
 0x2b1   :  { %v2921_v3 = vpop.f32.mrb[3].mxu1  ;;  %v683_v4 = vsel %vm587_vm1, %v629_v0, -inf }
 0x2b2   :  { %684 = vmax.xlane.f32.xlu1 %v683_v4 }
 0x2b6   :  { %v677_v6 = vpop.f32.mrb[4].mxu1 }
 0x2b7   :  { %v678_v7 = vadd.f32 %v3789_v5, %v677_v6  ;;  %v2926_v8 = vpop.f32.mrb[5].mxu1 }
 0x2b8   :  { %v680_v9 = vpop.f32.mrb[6].mxu1 }
 0x2b9   :  { %v2927_v10 = vpop.f32.mrb[7].mxu1  ;;  %v686_v11 = vsel %vm587_vm1, %v678_v7, -inf }
 0x2ba   :  { %687 = vmax.xlane.f32.xlu1 %v686_v11 }
 0x2cb   :  { %804 = vrot.lane.b32.xlu1 %v3753_v42, %s3424_s3 }
 0x33f   :  { %v685_v12 = vpop.xlane.xlu1 %684 }
 0x340   :  { %v689_v13 = vsub.f32 %v629_v0, %v685_v12 }
 0x342   :  { %v691_v14 = vmul.f32 1.442695, %v689_v13 }
 0x344   :  { %3297 = vpow2.f32 %v691_v14 }
 0x347   :  { %v688_v15 = vpop.xlane.xlu1 %687 }
 0x348   :  { %v690_v16 = vsub.f32 %v678_v7, %v688_v15 }
 0x34a   :  { %v693_v17 = vmul.f32 1.442695, %v690_v16 }
 0x34b   :  { %v805_v23 = vpop.permute.xlu1 %804 }
 0x34c   :  { %3299 = vpow2.f32 %v693_v17  ;;  %v810_v34 = vsel %vm587_vm1, %v805_v23, 0 }
 0x34e   :  { %v3298_v18 = vpop.eup %3297 }
 0x34f   :  { %v695_v19 = vsel %vm587_vm1, %v3298_v18, 0.0 }
 0x350   :  { %696 = vadd.xlane.f32.xlu0 %v695_v19 }
 0x356   :  { %v3300_v20 = vpop.eup %3299 }
 0x357   :  { %v698_v21 = vsel %vm587_vm1, %v3300_v20, 0.0 }
 0x358   :  { %699 = vadd.xlane.f32.xlu1 %v698_v21 }
 0x369   :  { %802 = vrot.lane.b32.xlu1 %v3763_v55, %s3425_s16 }
 0x36d   :  { %854 = vrot.lane.b32.xlu1 %v3756_v46, %s3424_s3 }
 0x371   :  { %852 = vrot.lane.b32.xlu1 %v3773_v59, %s3425_s16 }
 0x3dd   :  { %v697_v22 = vpop.xlane.xlu0 %696 }
 0x3de   :  { %3301 = vrcp.f32 %v697_v22 }
 0x3e5   :  { %v700_v24 = vpop.xlane.xlu1 %699 }
 0x3e6   :  { %3303 = vrcp.f32 %v700_v24 }
 0x3e8   :  { %v3302_v25 = vpop.eup %3301 }
 0x3e9   :  { %v703_v27 = vmul.f32 %v3302_v25, %v3298_v18  ;;  %v803_v33 = vpop.permute.xlu1 %802 }
 0x3eb   :  { %705 = vst.msk [vmem:[#allocation4] sm:$0xff] %vm587_vm1, %v703_v27  ;;  %v707_v28 = vpack.c.bf16 %v703_v27, %v703_v27 }
 0x3ed   :  { %2931 = vmatmul.mubr.msk.bf16.vlgmr.msra.gmra.mrb[8].mxu1 %vm587_vm1, %v707_v28  ;;  %v855_v35 = vpop.permute.xlu1 %854 }
 0x3ee   :  { %2935 = vmatpush3.bf16.msra.mxu1 %v760_v29  ;;  %2936 = vmatprep.mubr.msk.bf16.mxu1 %vm3422_vm0, %v3421_v36  ;;  %v860_v37 = vsel %vm587_vm1, %v855_v35, 0 }
 0x3ef   :  { %2940 = vmatprep.subr.bf16.mxu1 %v3421_v36 }
 0x3f0   :  { %v3304_v30 = vpop.eup %3303 }
 0x3f1   :  { %v704_v31 = vmul.f32 %v3304_v30, %v3300_v20  ;;  %v853_v38 = vpop.permute.xlu1 %852 }
 0x3f3   :  { %706 = vst.msk [vmem:[#allocation4 + $0x40] sm:$0xff] %vm587_vm1, %v704_v31  ;;  %v708_v32 = vpack.c.bf16 %v704_v31, %v704_v31 }
 0x3f5   :  { %2937 = vmatmul.mubr.msk.bf16.vlgmr.msra.gmra.mrb[12].mxu1 %vm587_vm1, %v708_v32 }
 0x3f6   :  { %2942 = vmatprep.mubr.msk.bf16.mxu1 %vm3422_vm0, %v3421_v36 }
 0x3f7   :  { %2941 = vmatpush3.bf16.xpose.msra.mxu1 %v810_v34 }
 0x3f8   :  { %2946 = vmatprep.subr.bf16.mxu1 %v3421_v36 }
 0x3fe   :  { %2943 = vmatmul.mubr.msk.bf16.vlgmr.msra.gmra.mrb[16].mxu1 %vm587_vm1, %v803_v33 }
 0x3ff   :  { %2947 = vmatpush3.bf16.xpose.msra.mxu1 %v860_v37  ;;  %2948 = vmatprep.mubr.msk.bf16.mxu1 %vm3422_vm0, %v3421_v36 }
 0x400   :  { %2952 = vmatprep.subr.bf16.mxu1 %v3421_v36 }
 0x406   :  { %2949 = vmatmul.mubr.msk.bf16.vlgmr.msra.gmra.mrb[20].mxu1 %vm587_vm1, %v853_v38 }
 0x407   :  { %2954 = vmatprep.mubr.msk.bf16.mxu1 %vm3422_vm0, %v3421_v36 }
 0x4c0   :  { %v3828_v39 = vpop.f32.mrb[8].mxu1 }
 0x4c1   :  { %v2932_v40 = vpop.f32.mrb[9].mxu1 }
 0x4c2   :  { %v753_v41 = vpop.f32.mrb[10].mxu1 }
 0x4c3   :  { %v2933_v43 = vpop.f32.mrb[11].mxu1 }
 0x4c8   :  { %v3830_v44 = vpop.f32.mrb[12].mxu1 }
 0x4c9   :  { %v2938_v45 = vpop.f32.mrb[13].mxu1 }
 0x4ca   :  { %v799_v47 = vpop.f32.mrb[14].mxu1 }
 0x4cb   :  { %v2939_v48 = vpop.f32.mrb[15].mxu1 }
 0x4d1   :  { %v846_v49 = vpop.f32.mrb[16].mxu1 }
 0x4d2   :  { %v847_v50 = vadd.f32 %v3785_v62, %v846_v49  ;;  %v2944_v51 = vpop.f32.mrb[17].mxu1 }
 0x4d3   :  { %v849_v52 = vpop.f32.mrb[18].mxu1 }
 0x4d4   :  { %v2945_v53 = vpop.f32.mrb[19].mxu1  ;;  %v902_v54 = vsel %vm587_vm1, %v847_v50, -inf }
 0x4d5   :  { %903 = vmax.xlane.f32.xlu0 %v902_v54 }
 0x4d9   :  { %v896_v56 = vpop.f32.mrb[20].mxu1 }
 0x4da   :  { %v897_v57 = vadd.f32 %v3789_v5, %v896_v56  ;;  %v2950_v60 = vpop.f32.mrb[21].mxu1 }
 0x4db   :  { %v899_v61 = vpop.f32.mrb[22].mxu1 }
 0x4dc   :  { %v2951_v63 = vpop.f32.mrb[23].mxu1  ;;  %v905_v0 = vsel %vm587_vm1, %v897_v57, -inf }
 0x4dd   :  { %906 = vmax.xlane.f32.xlu1 %v905_v0 }
 0x4eb   :  { %929 = vrot.lane.b32.xlu0 %v3771_v58, %s3425_s16 }
 0x4ee   :  { %1025 = vrot.lane.b32.xlu1 %v3763_v55, %s3426_s17 }
 0x562   :  { %v904_v1 = vpop.xlane.xlu0 %903 }
 0x563   :  { %v908_v2 = vsub.f32 %v847_v50, %v904_v1 }
 0x565   :  { %v910_v3 = vmul.f32 1.442695, %v908_v2 }
 0x566   :  { %v930_v4 = vpop.permute.xlu0 %929 }
 0x567   :  { %3305 = vpow2.f32 %v910_v3  ;;  %v935_v6 = vsel %vm712_vm2, %v930_v4, 0 }
 0x568   :  { %2953 = vmatpush3.bf16.msra.mxu1 %v935_v6 }
 0x569   :  { %2958 = vmatprep.subr.bf16.mxu1 %v3421_v36 }
 0x56a   :  { %v907_v9 = vpop.xlane.xlu1 %906 }
 0x56b   :  { %v909_v10 = vsub.f32 %v897_v57, %v907_v9 }
 0x56d   :  { %v912_v11 = vmul.f32 1.442695, %v909_v10 }
 0x56e   :  { %v1026_v28 = vpop.permute.xlu1 %1025 }
 0x56f   :  { %3307 = vpow2.f32 %v912_v11 }
 0x571   :  { %v3306_v7 = vpop.eup %3305 }
 0x572   :  { %v914_v8 = vsel %vm587_vm1, %v3306_v7, 0.0 }
 0x573   :  { %915 = vadd.xlane.f32.xlu0 %v914_v8 }
 0x579   :  { %v3308_v12 = vpop.eup %3307 }
 0x57a   :  { %v917_v13 = vsel %vm587_vm1, %v3308_v12, 0.0 }
 0x589   :  { %977 = vrot.lane.b32.xlu0 %v3805_v26, %s3425_s16 }
 0x5a8   :  { %918 = vadd.xlane.f32.xlu0 %v917_v13 }
 0x5be   :  { %1027 = vrot.lane.b32.xlu0 %v3753_v42, %s3427_s18 }
 0x5c2   :  { %1077 = vrot.lane.b32.xlu0 %v3756_v46, %s3427_s18 }
 0x5c6   :  { %1075 = vrot.lane.b32.xlu0 %v3773_v59, %s3426_s17 }
 0x600   :  { %v916_v14 = vpop.xlane.xlu0 %915 }
 0x601   :  { %3309 = vrcp.f32 %v916_v14 }
 0x604   :  { %v978_v17 = vpop.permute.xlu0 %977 }
 0x605   :  { %v983_v19 = vsel %vm712_vm2, %v978_v17, 0 }
 0x60b   :  { %v3310_v15 = vpop.eup %3309 }
 0x60c   :  { %v922_v16 = vmul.f32 %v3310_v15, %v3306_v7 }
 0x60e   :  { %925 = vst.msk [vmem:[#allocation4 + $0x8] sm:$0xff] %vm587_vm1, %v922_v16  ;;  %v927_v18 = vpack.c.bf16 %v922_v16, %v922_v16 }
 0x610   :  { %2955 = vmatmul.mubr.msk.bf16.vlgmr.msra.gmra.mrb[24].mxu1 %vm587_vm1, %v927_v18 }
 0x611   :  { %2959 = vmatpush3.bf16.msra.mxu1 %v983_v19  ;;  %2960 = vmatprep.mubr.msk.bf16.mxu1 %vm3422_vm0, %v3421_v36 }
 0x612   :  { %2964 = vmatprep.subr.bf16.mxu1 %v3421_v36 }
 0x635   :  { %v919_v20 = vpop.xlane.xlu0 %918 }
 0x636   :  { %3311 = vrcp.f32 %v919_v20 }
 0x639   :  { %v1028_v23 = vpop.permute.xlu0 %1027 }
 0x63a   :  { %v1033_v25 = vsel %vm587_vm1, %v1028_v23, 0 }
 0x63d   :  { %v1078_v27 = vpop.permute.xlu0 %1077 }
 0x63e   :  { %v1083_v29 = vsel %vm587_vm1, %v1078_v27, 0 }
 0x640   :  { %v3312_v21 = vpop.eup %3311 }
 0x641   :  { %v923_v22 = vmul.f32 %v3312_v21, %v3308_v12  ;;  %v1076_v30 = vpop.permute.xlu0 %1075 }
 0x643   :  { %926 = vst.msk [vmem:[#allocation4 + $0x48] sm:$0xff] %vm587_vm1, %v923_v22  ;;  %v928_v24 = vpack.c.bf16 %v923_v22, %v923_v22 }
 0x645   :  { %2961 = vmatmul.mubr.msk.bf16.vlgmr.msra.gmra.mrb[28].mxu1 %vm587_vm1, %v928_v24 }
 0x646   :  { %2965 = vmatpush3.bf16.xpose.msra.mxu1 %v1033_v25  ;;  %2966 = vmatprep.mubr.msk.bf16.mxu1 %vm3422_vm0, %v3421_v36 }
 0x647   :  { %2970 = vmatprep.subr.bf16.mxu1 %v3421_v36 }
 0x64d   :  { %2967 = vmatmul.mubr.msk.bf16.vlgmr.msra.gmra.mrb[32].mxu1 %vm587_vm1, %v1026_v28 }
 0x64e   :  { %2971 = vmatpush3.bf16.xpose.msra.mxu1 %v1083_v29  ;;  %2972 = vmatprep.mubr.msk.bf16.mxu1 %vm3422_vm0, %v3421_v36 }
 0x64f   :  { %2976 = vmatprep.subr.bf16.mxu1 %v3421_v36 }
 0x655   :  { %2973 = vmatmul.mubr.msk.bf16.vlgmr.msra.gmra.mrb[36].mxu1 %vm587_vm1, %v1076_v30 }
 0x656   :  { %2978 = vmatprep.mubr.msk.bf16.mxu1 %vm3422_vm0, %v3421_v36 }
 0x6e3   :  { %v3872_v31 = vpop.f32.mrb[24].mxu1 }
 0x6e4   :  { %v2956_v32 = vpop.f32.mrb[25].mxu1 }
 0x6e5   :  { %v974_v33 = vpop.f32.mrb[26].mxu1 }
 0x6e6   :  { %v2957_v34 = vpop.f32.mrb[27].mxu1 }
 0x718   :  { %v3874_v35 = vpop.f32.mrb[28].mxu1 }
 0x719   :  { %v3142_v37 = vpack.i.bf16 %v3874_v35, %v3872_v31  ;;  %v2962_v38 = vpop.f32.mrb[29].mxu1 }
 0x71a   :  { %v1022_v40 = vpop.f32.mrb[30].mxu1 }
 0x71b   :  { %v2963_v41 = vpop.f32.mrb[31].mxu1 }
 0x720   :  { %v1069_v43 = vpop.f32.mrb[32].mxu1 }
 0x721   :  { %v1070_v45 = vadd.f32 %v3785_v62, %v1069_v43  ;;  %v2968_v47 = vpop.f32.mrb[33].mxu1 }
 0x722   :  { %v1072_v48 = vpop.f32.mrb[34].mxu1 }
 0x723   :  { %v2969_v49 = vpop.f32.mrb[35].mxu1  ;;  %v1125_v50 = vsel %vm587_vm1, %v1070_v45, -inf }
 0x724   :  { %1126 = vmax.xlane.f32.xlu0 %v1125_v50 }
 0x728   :  { %v1119_v51 = vpop.f32.mrb[36].mxu1 }
 0x729   :  { %v1120_v52 = vadd.f32 %v3789_v5, %v1119_v51  ;;  %v2974_v53 = vpop.f32.mrb[37].mxu1 }
 0x72a   :  { %v1122_v54 = vpop.f32.mrb[38].mxu1 }
 0x72b   :  { %v2975_v56 = vpop.f32.mrb[39].mxu1  ;;  %v1128_v57 = vsel %vm587_vm1, %v1120_v52, -inf }
 0x72c   :  { %1129 = vmax.xlane.f32.xlu1 %v1128_v57 }
 0x73d   :  { %1200 = vrot.lane.b32.xlu1 %v3805_v26, %s3426_s17 }
 0x741   :  { %1250 = vrot.lane.b32.xlu1 %v3753_v42, %s3428_s19 }
 0x745   :  { %1300 = vrot.lane.b32.xlu1 %v3756_v46, %s3428_s19 }
 0x7b1   :  { %v1127_v60 = vpop.xlane.xlu0 %1126 }
 0x7b2   :  { %v1131_v61 = vsub.f32 %v1070_v45, %v1127_v60 }
 0x7b4   :  { %v1133_v63 = vmul.f32 1.442695, %v1131_v61 }
 0x7b6   :  { %3313 = vpow2.f32 %v1133_v63 }
 0x7b9   :  { %v1130_v0 = vpop.xlane.xlu1 %1129 }
 0x7ba   :  { %v1132_v1 = vsub.f32 %v1120_v52, %v1130_v0 }
 0x7bc   :  { %v1135_v2 = vmul.f32 1.442695, %v1132_v1 }
 0x7bd   :  { %v1201_v14 = vpop.permute.xlu1 %1200 }
 0x7be   :  { %3315 = vpow2.f32 %v1135_v2  ;;  %v1206_v16 = vsel %vm712_vm2, %v1201_v14, 0 }
 0x7c0   :  { %v3314_v3 = vpop.eup %3313 }
 0x7c1   :  { %v1137_v4 = vsel %vm587_vm1, %v3314_v3, 0.0  ;;  %v1251_v20 = vpop.permute.xlu1 %1250 }
 0x7c2   :  { %1138 = vadd.xlane.f32.xlu0 %v1137_v4  ;;  %v1256_v21 = vsel %vm587_vm1, %v1251_v20, 0 }
 0x7c5   :  { %v1301_v22 = vpop.permute.xlu1 %1300 }
 0x7c6   :  { %v1306_v24 = vsel %vm587_vm1, %v1301_v22, 0 }
 0x7c8   :  { %v3316_v6 = vpop.eup %3315 }
 0x7c9   :  { %v1140_v7 = vsel %vm587_vm1, %v3316_v6, 0.0 }
 0x7ca   :  { %1141 = vadd.xlane.f32.xlu0 %v1140_v7 }
 0x7e0   :  { %1152 = vrot.lane.b32.xlu0 %v3771_v58, %s3426_s17 }
 0x7e4   :  { %1248 = vrot.lane.b32.xlu0 %v3763_v55, %s3429_s20 }
 0x7e8   :  { %1298 = vrot.lane.b32.xlu0 %v3773_v59, %s3429_s20 }
 0x84f   :  { %v1139_v8 = vpop.xlane.xlu0 %1138 }
 0x850   :  { %3317 = vrcp.f32 %v1139_v8 }
 0x857   :  { %v1142_v9 = vpop.xlane.xlu0 %1141 }
 0x858   :  { %3319 = vrcp.f32 %v1142_v9 }
 0x85a   :  { %v3318_v10 = vpop.eup %3317 }
 0x85b   :  { %v1145_v11 = vmul.f32 %v3318_v10, %v3314_v3  ;;  %v1153_v12 = vpop.permute.xlu0 %1152 }
 0x85c   :  { %v1158_v13 = vsel %vm712_vm2, %v1153_v12, 0 }
 0x85d   :  { %1148 = vst.msk [vmem:[#allocation4 + $0x10] sm:$0xff] %vm587_vm1, %v1145_v11  ;;  %2977 = vmatpush3.bf16.msra.mxu1 %v1158_v13  ;;  %v1150_v15 = vpack.c.bf16 %v1145_v11, %v1145_v11 }
 0x85e   :  { %2982 = vmatprep.subr.bf16.mxu1 %v3421_v36 }
 0x85f   :  { %v1249_v23 = vpop.permute.xlu0 %1248 }
 0x860   :  { %2979 = vmatmul.mubr.msk.bf16.vlgmr.msra.gmra.mrb[40].mxu1 %vm587_vm1, %v1150_v15 }
 0x861   :  { %2983 = vmatpush3.bf16.msra.mxu1 %v1206_v16  ;;  %2984 = vmatprep.mubr.msk.bf16.mxu1 %vm3422_vm0, %v3421_v36 }
 0x862   :  { %v3320_v17 = vpop.eup %3319  ;;  %2988 = vmatprep.subr.bf16.mxu1 %v3421_v36 }
 0x863   :  { %v1146_v18 = vmul.f32 %v3320_v17, %v3316_v6  ;;  %v1299_v25 = vpop.permute.xlu0 %1298 }
 0x865   :  { %1149 = vst.msk [vmem:[#allocation4 + $0x50] sm:$0xff] %vm587_vm1, %v1146_v18  ;;  %v1151_v19 = vpack.c.bf16 %v1146_v18, %v1146_v18 }
 0x868   :  { %2985 = vmatmul.mubr.msk.bf16.vlgmr.msra.gmra.mrb[44].mxu1 %vm587_vm1, %v1151_v19 }
 0x869   :  { %2990 = vmatprep.mubr.msk.bf16.mxu1 %vm3422_vm0, %v3421_v36 }
 0x86a   :  { %2989 = vmatpush3.bf16.xpose.msra.mxu1 %v1256_v21 }
 0x86b   :  { %2994 = vmatprep.subr.bf16.mxu1 %v3421_v36 }
 0x871   :  { %2991 = vmatmul.mubr.msk.bf16.vlgmr.msra.gmra.mrb[48].mxu1 %vm587_vm1, %v1249_v23 }
 0x872   :  { %2995 = vmatpush3.bf16.xpose.msra.mxu1 %v1306_v24  ;;  %2996 = vmatprep.mubr.msk.bf16.mxu1 %vm3422_vm0, %v3421_v36 }
 0x873   :  { %3000 = vmatprep.subr.bf16.mxu1 %v3421_v36 }
 0x879   :  { %2997 = vmatmul.mubr.msk.bf16.vlgmr.msra.gmra.mrb[52].mxu1 %vm587_vm1, %v1299_v25 }
 0x87a   :  { %3002 = vmatprep.mubr.msk.bf16.mxu1 %vm3422_vm0, %v3421_v36 }
 0x933   :  { %v3918_v27 = vpop.f32.mrb[40].mxu1 }
 0x934   :  { %v2980_v28 = vpop.f32.mrb[41].mxu1 }
 0x935   :  { %v1197_v29 = vpop.f32.mrb[42].mxu1 }
 0x936   :  { %v2981_v30 = vpop.f32.mrb[43].mxu1 }
 0x93b   :  { %v3920_v32 = vpop.f32.mrb[44].mxu1 }
 0x93c   :  { %v3147_v33 = vpack.i.bf16 %v3920_v32, %v3918_v27  ;;  %v2986_v34 = vpop.f32.mrb[45].mxu1 }
 0x93d   :  { %v1245_v38 = vpop.f32.mrb[46].mxu1 }
 0x93e   :  { %v2987_v40 = vpop.f32.mrb[47].mxu1 }
 0x944   :  { %v1292_v41 = vpop.f32.mrb[48].mxu1 }
 0x945   :  { %v1293_v43 = vadd.f32 %v3785_v62, %v1292_v41  ;;  %v2992_v45 = vpop.f32.mrb[49].mxu1 }
 0x946   :  { %v1295_v47 = vpop.f32.mrb[50].mxu1 }
 0x947   :  { %v2993_v48 = vpop.f32.mrb[51].mxu1  ;;  %v1348_v49 = vsel %vm587_vm1, %v1293_v43, -inf }
 0x948   :  { %1349 = vmax.xlane.f32.xlu1 %v1348_v49 }
 0x94c   :  { %v1342_v50 = vpop.f32.mrb[52].mxu1 }
 0x94d   :  { %v1343_v51 = vadd.f32 %v3789_v5, %v1342_v50  ;;  %v2998_v52 = vpop.f32.mrb[53].mxu1 }
 0x94e   :  { %v1345_v53 = vpop.f32.mrb[54].mxu1 }
 0x94f   :  { %v2999_v54 = vpop.f32.mrb[55].mxu1  ;;  %v1351_v56 = vsel %vm587_vm1, %v1343_v51, -inf }
 0x950   :  { %1352 = vmax.xlane.f32.xlu0 %v1351_v56 }
 0x959   :  { %1423 = vrot.lane.b32.xlu1 %v3805_v26, %s3429_s20 }
 0x9d5   :  { %v1350_v57 = vpop.xlane.xlu1 %1349 }
 0x9d6   :  { %v1354_v60 = vsub.f32 %v1293_v43, %v1350_v57 }
 0x9d8   :  { %v1356_v61 = vmul.f32 1.442695, %v1354_v60 }
 0x9d9   :  { %v1424_v8 = vpop.permute.xlu1 %1423 }
 0x9da   :  { %3321 = vpow2.f32 %v1356_v61  ;;  %v1429_v15 = vsel %vm712_vm2, %v1424_v8, 0 }
 0x9dd   :  { %v1353_v63 = vpop.xlane.xlu0 %1352 }
 0x9de   :  { %v1355_v0 = vsub.f32 %v1343_v51, %v1353_v63 }
 0x9e0   :  { %v1358_v1 = vmul.f32 1.442695, %v1355_v0 }
 0x9e2   :  { %3323 = vpow2.f32 %v1358_v1 }
 0x9e4   :  { %v3322_v2 = vpop.eup %3321 }
 0x9e5   :  { %v1360_v3 = vsel %vm587_vm1, %v3322_v2, 0.0 }
 0x9e6   :  { %1361 = vadd.xlane.f32.xlu0 %v1360_v3 }
 0x9ec   :  { %v3324_v4 = vpop.eup %3323 }
 0x9ed   :  { %v1363_v6 = vsel %vm587_vm1, %v3324_v4, 0.0 }
 0x9ee   :  { %1364 = vadd.xlane.f32.xlu1 %v1363_v6 }
 0x9fc   :  { %1375 = vrot.lane.b32.xlu0 %v3771_v58, %s3429_s20 }
 0x9ff   :  { %1473 = vrot.lane.b32.xlu1 %v3753_v42, %s3430_s21 }
 0xa00   :  { %1471 = vrot.lane.b32.xlu0 %v3763_v55, %s3431_s22 }
 0xa03   :  { %1523 = vrot.lane.b32.xlu1 %v3756_v46, %s3430_s21 }
 0xa04   :  { %1521 = vrot.lane.b32.xlu0 %v3773_v59, %s3431_s22 }
 0xa73   :  { %v1362_v7 = vpop.xlane.xlu0 %1361 }
 0xa74   :  { %3325 = vrcp.f32 %v1362_v7 }
 0xa77   :  { %v1376_v9 = vpop.permute.xlu0 %1375 }
 0xa78   :  { %v1381_v10 = vsel %vm712_vm2, %v1376_v9, 0 }
 0xa79   :  { %3001 = vmatpush3.bf16.msra.mxu1 %v1381_v10 }
 0xa7a   :  { %3006 = vmatprep.subr.bf16.mxu1 %v3421_v36 }
 0xa7b   :  { %v1365_v11 = vpop.xlane.xlu1 %1364  ;;  %v1472_v22 = vpop.permute.xlu0 %1471 }
 0xa7c   :  { %3327 = vrcp.f32 %v1365_v11 }
 0xa7e   :  { %v3326_v12 = vpop.eup %3325 }
 0xa7f   :  { %v1368_v13 = vmul.f32 %v3326_v12, %v3322_v2  ;;  %v1474_v18 = vpop.permute.xlu1 %1473  ;;  %v1522_v24 = vpop.permute.xlu0 %1521 }
 0xa80   :  { %v1479_v20 = vsel %vm587_vm1, %v1474_v18, 0 }
 0xa81   :  { %1371 = vst.msk [vmem:[#allocation4 + $0x18] sm:$0xff] %vm587_vm1, %v1368_v13  ;;  %v1373_v14 = vpack.c.bf16 %v1368_v13, %v1368_v13 }
 0xa83   :  { %3003 = vmatmul.mubr.msk.bf16.vlgmr.msra.gmra.mrb[56].mxu1 %vm587_vm1, %v1373_v14  ;;  %v1524_v21 = vpop.permute.xlu1 %1523 }
 0xa84   :  { %3007 = vmatpush3.bf16.msra.mxu1 %v1429_v15  ;;  %3008 = vmatprep.mubr.msk.bf16.mxu1 %vm3422_vm0, %v3421_v36  ;;  %v1529_v23 = vsel %vm587_vm1, %v1524_v21, 0 }
 0xa85   :  { %3012 = vmatprep.subr.bf16.mxu1 %v3421_v36 }
 0xa86   :  { %v3328_v16 = vpop.eup %3327 }
 0xa87   :  { %v1369_v17 = vmul.f32 %v3328_v16, %v3324_v4 }
 0xa89   :  { %1372 = vst.msk [vmem:[#allocation4 + $0x58] sm:$0xff] %vm587_vm1, %v1369_v17  ;;  %v1374_v19 = vpack.c.bf16 %v1369_v17, %v1369_v17 }
 0xa8b   :  { %3009 = vmatmul.mubr.msk.bf16.vlgmr.msra.gmra.mrb[60].mxu1 %vm587_vm1, %v1374_v19 }
 0xa8c   :  { %3014 = vmatprep.mubr.msk.bf16.mxu1 %vm3422_vm0, %v3421_v36 }
 0xa8d   :  { %3013 = vmatpush3.bf16.xpose.msra.mxu1 %v1479_v20 }
 0xa8e   :  { %3018 = vmatprep.subr.bf16.mxu1 %v3421_v36 }
 0xa94   :  { %3015 = vmatmul.mubr.msk.bf16.vlgmr.msra.gmra.mrb[64].mxu1 %vm587_vm1, %v1472_v22 }
 0xa95   :  { %3019 = vmatpush3.bf16.xpose.msra.mxu1 %v1529_v23  ;;  %3020 = vmatprep.mubr.msk.bf16.mxu1 %vm3422_vm0, %v3421_v36 }
 0xa96   :  { %3030 = vmatprep.subr.bf16.mxu1 %v3421_v36 }
 0xa9c   :  { %3021 = vmatmul.mubr.msk.bf16.vlgmr.msra.gmra.mrb[68].mxu1 %vm587_vm1, %v1522_v24 }
 0xa9d   :  { %3032 = vmatprep.mubr.msk.bf16.mxu1 %vm3422_vm0, %v3421_v36 }
 0xb56   :  { %v3964_v25 = vpop.f32.mrb[56].mxu1 }
 0xb57   :  { %v3004_v28 = vpop.f32.mrb[57].mxu1 }
 0xb58   :  { %v1420_v29 = vpop.f32.mrb[58].mxu1 }
 0xb59   :  { %v3005_v30 = vpop.f32.mrb[59].mxu1 }
 0xb5e   :  { %v3966_v34 = vpop.f32.mrb[60].mxu1 }
 0xb5f   :  { %v3152_v38 = vpack.i.bf16 %v3966_v34, %v3964_v25  ;;  %v3010_v40 = vpop.f32.mrb[61].mxu1 }
 0xb60   :  { %v1468_v41 = vpop.f32.mrb[62].mxu1 }
 0xb61   :  { %v3011_v43 = vpop.f32.mrb[63].mxu1 }
 0xb67   :  { %v1515_v45 = vpop.f32.mrb[64].mxu1 }
 0xb68   :  { %v1516_v47 = vadd.f32 %v3785_v62, %v1515_v45  ;;  %v3016_v48 = vpop.f32.mrb[65].mxu1 }
 0xb69   :  { %v1518_v49 = vpop.f32.mrb[66].mxu1 }
 0xb6a   :  { %v3017_v50 = vpop.f32.mrb[67].mxu1  ;;  %v1571_v51 = vsel %vm587_vm1, %v1516_v47, -inf }
 0xb6b   :  { %1572 = vmax.xlane.f32.xlu1 %v1571_v51 }
 0xb6f   :  { %v1565_v52 = vpop.f32.mrb[68].mxu1 }
 0xb70   :  { %v1566_v53 = vadd.f32 %v3789_v5, %v1565_v52  ;;  %v3022_v54 = vpop.f32.mrb[69].mxu1 }
 0xb71   :  { %v1568_v56 = vpop.f32.mrb[70].mxu1 }
 0xb72   :  { %v3023_v57 = vpop.f32.mrb[71].mxu1  ;;  %v1574_v60 = vsel %vm587_vm1, %v1566_v53, -inf }
 0xb73   :  { %1575 = vmax.xlane.f32.xlu0 %v1574_v60 }
 0xb7c   :  { %1646 = vrot.lane.b32.xlu1 %v3805_v26, %s3431_s22 }
 0xb89   :  { %1598 = vrot.lane.b32.xlu0 %v3771_v58, %s3431_s22 }
 0xbf8   :  { %v1573_v61 = vpop.xlane.xlu1 %1572 }
 0xbf9   :  { %v1577_v63 = vsub.f32 %v1516_v47, %v1573_v61 }
 0xbfb   :  { %v1579_v0 = vmul.f32 1.442695, %v1577_v63 }
 0xbfc   :  { %v1647_v1 = vpop.permute.xlu1 %1646 }
 0xbfd   :  { %3329 = vpow2.f32 %v1579_v0  ;;  %v1652_v2 = vsel %vm712_vm2, %v1647_v1, 0 }
 0xbfe   :  { %3031 = vmatpush3.bf16.msra.mxu1 %v1652_v2 }
 0xbff   :  { %3042 = vmatprep.subr.bf16.mxu1 %v3421_v36 }
 0xc00   :  { %v1576_v3 = vpop.xlane.xlu0 %1575 }
 0xc01   :  { %v1578_v4 = vsub.f32 %v1566_v53, %v1576_v3 }
 0xc03   :  { %v1581_v6 = vmul.f32 1.442695, %v1578_v4 }
 0xc04   :  { %v1599_v7 = vpop.permute.xlu0 %1598 }
 0xc05   :  { %3331 = vpow2.f32 %v1581_v6  ;;  %v1604_v8 = vsel %vm712_vm2, %v1599_v7, 0 }
 0xc06   :  { %3025 = vmatpush3.bf16.msra.mxu0 %v1604_v8 }
 0xc07   :  { %v3330_v9 = vpop.eup %3329  ;;  %3036 = vmatprep.subr.bf16.mxu0 %v3421_v36 }
 0xc08   :  { %v1583_v10 = vsel %vm587_vm1, %v3330_v9, 0.0 }
 0xc09   :  { %1584 = vadd.xlane.f32.xlu0 %v1583_v10 }
 0xc0f   :  { %v3332_v11 = vpop.eup %3331 }
 0xc10   :  { %v1586_v12 = vsel %vm587_vm1, %v3332_v11, 0.0 }
 0xc11   :  { %1587 = vadd.xlane.f32.xlu1 %v1586_v12 }
 0xc1f   :  { %1746 = vrot.lane.b32.xlu0 %v3756_v46, %s3432_s23 }
 0xc22   :  { %1696 = vrot.lane.b32.xlu1 %v3753_v42, %s3432_s23 }
 0xc23   :  { %1744 = vrot.lane.b32.xlu0 %v3773_v59, %s3433_s24 }
 0xc26   :  { %1694 = vrot.lane.b32.xlu1 %v3763_v55, %s3433_s24 }
 0xc96   :  { %v1585_v13 = vpop.xlane.xlu0 %1584 }
 0xc97   :  { %3333 = vrcp.f32 %v1585_v13 }
 0xc9a   :  { %v1747_v22 = vpop.permute.xlu0 %1746 }
 0xc9b   :  { %v1752_v28 = vsel %vm587_vm1, %v1747_v22, 0 }
 0xc9e   :  { %v1588_v14 = vpop.xlane.xlu1 %1587  ;;  %v1745_v29 = vpop.permute.xlu0 %1744 }
 0xc9f   :  { %3335 = vrcp.f32 %v1588_v14 }
 0xca1   :  { %v3334_v15 = vpop.eup %3333 }
 0xca2   :  { %v1591_v16 = vmul.f32 %v3334_v15, %v3330_v9  ;;  %v1697_v17 = vpop.permute.xlu1 %1696 }
 0xca3   :  { %v1702_v19 = vsel %vm587_vm1, %v1697_v17, 0 }
 0xca4   :  { %1594 = vst.msk [vmem:[#allocation4 + $0x20] sm:$0xff] %vm587_vm1, %v1591_v16  ;;  %v1596_v18 = vpack.c.bf16 %v1591_v16, %v1591_v16 }
 0xca6   :  { %3027 = vmatmul.mubr.msk.bf16.vlgmr.msra.gmra.mrb[12].mxu0 %vm587_vm1, %v1596_v18  ;;  %v1695_v24 = vpop.permute.xlu1 %1694 }
 0xca7   :  { %3037 = vmatpush3.bf16.xpose.msra.mxu0 %v1702_v19  ;;  %3038 = vmatprep.mubr.msk.bf16.mxu0 %vm3422_vm0, %v3421_v36 }
 0xca8   :  { %3048 = vmatprep.subr.bf16.mxu0 %v3421_v36 }
 0xca9   :  { %v3336_v20 = vpop.eup %3335 }
 0xcaa   :  { %v1592_v21 = vmul.f32 %v3336_v20, %v3332_v11 }
 0xcac   :  { %1595 = vst.msk [vmem:[#allocation4 + $0x60] sm:$0xff] %vm587_vm1, %v1592_v21  ;;  %v1597_v23 = vpack.c.bf16 %v1592_v21, %v1592_v21 }
 0xcae   :  { %3033 = vmatmul.mubr.msk.bf16.vlgmr.msra.gmra.mrb[72].mxu1 %vm587_vm1, %v1597_v23  ;;  %3039 = vmatmul.mubr.msk.bf16.vlgmr.msra.gmra.mrb[16].mxu0 %vm587_vm1, %v1695_v24 }
 0xcaf   :  { %3043 = vmatpush3.bf16.xpose.msra.mxu1 %v1752_v28  ;;  %3044 = vmatprep.mubr.msk.bf16.mxu1 %vm3422_vm0, %v3421_v36 }
 0xcb0   :  { %3054 = vmatprep.subr.bf16.mxu1 %v3421_v36  ;;  %3050 = vmatprep.mubr.msk.bf16.mxu0 %vm3422_vm0, %v3421_v36 }
 0xcb6   :  { %3045 = vmatmul.mubr.msk.bf16.vlgmr.msra.gmra.mrb[76].mxu1 %vm587_vm1, %v1745_v29 }
 0xcb7   :  { %3056 = vmatprep.mubr.msk.bf16.mxu1 %vm3422_vm0, %v3421_v36 }
 0xd79   :  { %v4010_v30 = vpop.f32.mrb[12].mxu0 }
 0xd7a   :  { %v3028_v40 = vpop.f32.mrb[13].mxu0 }
 0xd7b   :  { %v1643_v41 = vpop.f32.mrb[14].mxu0 }
 0xd7c   :  { %v3029_v43 = vpop.f32.mrb[15].mxu0 }
 0xd81   :  { %v4012_v45 = vpop.f32.mrb[72].mxu1  ;;  %v1738_v47 = vpop.f32.mrb[16].mxu0 }
 0xd82   :  { %v3157_v48 = vpack.i.bf16 %v4012_v45, %v4010_v30  ;;  %v1739_v49 = vadd.f32 %v3785_v62, %v1738_v47  ;;  %v3034_v50 = vpop.f32.mrb[73].mxu1  ;;  %v3040_v51 = vpop.f32.mrb[17].mxu0  ;;  %v3273_v45 = vld [vmem:[%s4295_s5] ss:$16 sps:$4 sm:$0xff]  }
 0xd83   :  { %v1691_v52 = vpop.f32.mrb[74].mxu1  ;;  %v1741_v53 = vpop.f32.mrb[18].mxu0 }
 0xd84   :  { %v3035_v54 = vpop.f32.mrb[75].mxu1  ;;  %v3041_v56 = vpop.f32.mrb[19].mxu0  ;;  %v1794_v57 = vsel %vm587_vm1, %v1739_v49, -inf }
 0xd85   :  { %1795 = vmax.xlane.f32.xlu1 %v1794_v57 }
 0xd89   :  { %v1788_v60 = vpop.f32.mrb[76].mxu1 }
 0xd8a   :  { %v1789_v61 = vadd.f32 %v3789_v5, %v1788_v60  ;;  %v3046_v63 = vpop.f32.mrb[77].mxu1 }
 0xd8b   :  { %v1791_v0 = vpop.f32.mrb[78].mxu1 }
 0xd8c   :  { %v3047_v1 = vpop.f32.mrb[79].mxu1  ;;  %v1797_v2 = vsel %vm587_vm1, %v1789_v61, -inf }
 0xd8d   :  { %1798 = vmax.xlane.f32.xlu0 %v1797_v2 }
 0xd96   :  { %1869 = vrot.lane.b32.xlu1 %v3805_v26, %s3433_s24 }
 0xda3   :  { %1821 = vrot.lane.b32.xlu0 %v3771_v58, %s3433_s24 }
 0xe12   :  { %v1796_v3 = vpop.xlane.xlu1 %1795 }
 0xe13   :  { %v1800_v4 = vsub.f32 %v1739_v49, %v1796_v3 }
 0xe15   :  { %v1802_v6 = vmul.f32 1.442695, %v1800_v4 }
 0xe16   :  { %v1870_v7 = vpop.permute.xlu1 %1869 }
 0xe17   :  { %3337 = vpow2.f32 %v1802_v6  ;;  %v1875_v8 = vsel %vm712_vm2, %v1870_v7, 0 }
 0xe18   :  { %3055 = vmatpush3.bf16.msra.mxu1 %v1875_v8 }
 0xe19   :  { %3066 = vmatprep.subr.bf16.mxu1 %v3421_v36 }
 0xe1a   :  { %v1799_v9 = vpop.xlane.xlu0 %1798 }
 0xe1b   :  { %v1801_v10 = vsub.f32 %v1789_v61, %v1799_v9 }
 0xe1d   :  { %v1804_v11 = vmul.f32 1.442695, %v1801_v10 }
 0xe1e   :  { %v1822_v12 = vpop.permute.xlu0 %1821 }
 0xe1f   :  { %3339 = vpow2.f32 %v1804_v11  ;;  %v1827_v13 = vsel %vm712_vm2, %v1822_v12, 0 }
 0xe20   :  { %3049 = vmatpush3.bf16.msra.mxu0 %v1827_v13 }
 0xe21   :  { %v3338_v14 = vpop.eup %3337  ;;  %3060 = vmatprep.subr.bf16.mxu0 %v3421_v36 }
 0xe22   :  { %v1806_v15 = vsel %vm587_vm1, %v3338_v14, 0.0 }
 0xe23   :  { %1807 = vadd.xlane.f32.xlu0 %v1806_v15 }
 0xe29   :  { %v3340_v16 = vpop.eup %3339 }
 0xe2a   :  { %v1809_v17 = vsel %vm587_vm1, %v3340_v16, 0.0 }
 0xe2b   :  { %1810 = vadd.xlane.f32.xlu1 %v1809_v17 }
 0xe39   :  { %1969 = vrot.lane.b32.xlu0 %v3756_v46, %s3434_s25 }
 0xe3c   :  { %1919 = vrot.lane.b32.xlu1 %v3753_v42, %s3434_s25 }
 0xe3d   :  { %1967 = vrot.lane.b32.xlu0 %v3773_v59, %s3435_s26 }
 0xe40   :  { %1917 = vrot.lane.b32.xlu1 %v3763_v55, %s3435_s26 }
 0xeb0   :  { %v1808_v18 = vpop.xlane.xlu0 %1807 }
 0xeb1   :  { %3341 = vrcp.f32 %v1808_v18 }
 0xeb4   :  { %v1970_v40 = vpop.permute.xlu0 %1969 }
 0xeb5   :  { %v1975_v47 = vsel %vm587_vm1, %v1970_v40, 0 }
 0xeb8   :  { %v1811_v19 = vpop.xlane.xlu1 %1810  ;;  %v1968_v49 = vpop.permute.xlu0 %1967 }
 0xeb9   :  { %3343 = vrcp.f32 %v1811_v19 }
 0xebb   :  { %v3342_v20 = vpop.eup %3341 }
 0xebc   :  { %v1814_v21 = vmul.f32 %v3342_v20, %v3338_v14  ;;  %v1920_v22 = vpop.permute.xlu1 %1919 }
 0xebd   :  { %v1925_v24 = vsel %vm587_vm1, %v1920_v22, 0 }
 0xebe   :  { %1817 = vst.msk [vmem:[#allocation4 + $0x28] sm:$0xff] %vm587_vm1, %v1814_v21  ;;  %v1819_v23 = vpack.c.bf16 %v1814_v21, %v1814_v21 }
 0xec0   :  { %3051 = vmatmul.mubr.msk.bf16.vlgmr.msra.gmra.mrb[20].mxu0 %vm587_vm1, %v1819_v23  ;;  %v1918_v43 = vpop.permute.xlu1 %1917 }
 0xec1   :  { %3061 = vmatpush3.bf16.xpose.msra.mxu0 %v1925_v24  ;;  %3062 = vmatprep.mubr.msk.bf16.mxu0 %vm3422_vm0, %v3421_v36 }
 0xec2   :  { %3072 = vmatprep.subr.bf16.mxu0 %v3421_v36 }
 0xec3   :  { %v3344_v28 = vpop.eup %3343 }
 0xec4   :  { %v1815_v29 = vmul.f32 %v3344_v28, %v3340_v16 }
 0xec6   :  { %1818 = vst.msk [vmem:[#allocation4 + $0x68] sm:$0xff] %vm587_vm1, %v1815_v29  ;;  %v1820_v41 = vpack.c.bf16 %v1815_v29, %v1815_v29 }
 0xec8   :  { %3057 = vmatmul.mubr.msk.bf16.vlgmr.msra.gmra.mrb[80].mxu1 %vm587_vm1, %v1820_v41  ;;  %3063 = vmatmul.mubr.msk.bf16.vlgmr.msra.gmra.mrb[24].mxu0 %vm587_vm1, %v1918_v43 }
 0xec9   :  { %3067 = vmatpush3.bf16.xpose.msra.mxu1 %v1975_v47  ;;  %3068 = vmatprep.mubr.msk.bf16.mxu1 %vm3422_vm0, %v3421_v36 }
 0xeca   :  { %3078 = vmatprep.subr.bf16.mxu1 %v3421_v36  ;;  %3074 = vmatprep.mubr.msk.bf16.mxu0 %vm3422_vm0, %v3421_v36 }
 0xed0   :  { %3069 = vmatmul.mubr.msk.bf16.vlgmr.msra.gmra.mrb[84].mxu1 %vm587_vm1, %v1968_v49 }
 0xed1   :  { %3080 = vmatprep.mubr.msk.bf16.mxu1 %vm3422_vm0, %v3421_v36 }
 0xf93   :  { %v4056_v50 = vpop.f32.mrb[20].mxu0 }
 0xf94   :  { %v3052_v51 = vpop.f32.mrb[21].mxu0 }
 0xf95   :  { %v1866_v52 = vpop.f32.mrb[22].mxu0 }
 0xf96   :  { %v3053_v53 = vpop.f32.mrb[23].mxu0 }
 0xf9b   :  { %v4058_v54 = vpop.f32.mrb[80].mxu1  ;;  %v1961_v56 = vpop.f32.mrb[24].mxu0 }
 0xf9c   :  { %v3162_v57 = vpack.i.bf16 %v4058_v54, %v4056_v50  ;;  %v1962_v60 = vadd.f32 %v3785_v62, %v1961_v56  ;;  %v3058_v61 = vpop.f32.mrb[81].mxu1  ;;  %v3064_v63 = vpop.f32.mrb[25].mxu0  ;;  %v3276_v50 = vld [vmem:[%s4295_s5 + $0x8] ss:$16 sps:$4 sm:$0xff]   ;;  %v3278_v54 = vld [vmem:[%s4295_s5 + $0xc] ss:$16 sps:$4 sm:$0xff]  }
 0xf9d   :  { %v1914_v0 = vpop.f32.mrb[82].mxu1  ;;  %v1964_v1 = vpop.f32.mrb[26].mxu0 }
 0xf9e   :  { %v3059_v2 = vpop.f32.mrb[83].mxu1  ;;  %v3065_v3 = vpop.f32.mrb[27].mxu0  ;;  %v2017_v4 = vsel %vm587_vm1, %v1962_v60, -inf }
 0xf9f   :  { %2018 = vmax.xlane.f32.xlu1 %v2017_v4 }
 0xfa3   :  { %v2011_v6 = vpop.f32.mrb[84].mxu1 }
 0xfa4   :  { %v2012_v7 = vadd.f32 %v3789_v5, %v2011_v6  ;;  %v3070_v8 = vpop.f32.mrb[85].mxu1 }
 0xfa5   :  { %v2014_v9 = vpop.f32.mrb[86].mxu1 }
 0xfa6   :  { %v3071_v10 = vpop.f32.mrb[87].mxu1  ;;  %v2020_v11 = vsel %vm587_vm1, %v2012_v7, -inf }
 0xfa7   :  { %2021 = vmax.xlane.f32.xlu0 %v2020_v11 }
 0xfb0   :  { %2092 = vrot.lane.b32.xlu1 %v3805_v26, %s3435_s26 }
 0xfbd   :  { %2044 = vrot.lane.b32.xlu0 %v3771_v58, %s3435_s26 }
0x102c   :  { %v2019_v12 = vpop.xlane.xlu1 %2018 }
0x102d   :  { %v2023_v13 = vsub.f32 %v1962_v60, %v2019_v12 }
0x102f   :  { %v2025_v14 = vmul.f32 1.442695, %v2023_v13 }
0x1030   :  { %v2093_v15 = vpop.permute.xlu1 %2092 }
0x1031   :  { %3345 = vpow2.f32 %v2025_v14  ;;  %v2098_v16 = vsel %vm712_vm2, %v2093_v15, 0 }
0x1032   :  { %3079 = vmatpush3.bf16.msra.mxu1 %v2098_v16 }
0x1033   :  { %3090 = vmatprep.subr.bf16.mxu1 %v3421_v36 }
0x1034   :  { %v2022_v17 = vpop.xlane.xlu0 %2021 }
0x1035   :  { %v2024_v18 = vsub.f32 %v2012_v7, %v2022_v17 }
0x1037   :  { %v2027_v19 = vmul.f32 1.442695, %v2024_v18 }
0x1038   :  { %v2045_v20 = vpop.permute.xlu0 %2044 }
0x1039   :  { %3347 = vpow2.f32 %v2027_v19  ;;  %v2050_v21 = vsel %vm712_vm2, %v2045_v20, 0 }
0x103a   :  { %3073 = vmatpush3.bf16.msra.mxu0 %v2050_v21 }
0x103b   :  { %v3346_v22 = vpop.eup %3345  ;;  %3084 = vmatprep.subr.bf16.mxu0 %v3421_v36 }
0x103c   :  { %v2029_v23 = vsel %vm587_vm1, %v3346_v22, 0.0 }
0x103d   :  { %2030 = vadd.xlane.f32.xlu0 %v2029_v23 }
0x1043   :  { %v3348_v24 = vpop.eup %3347 }
0x1044   :  { %v2032_v28 = vsel %vm587_vm1, %v3348_v24, 0.0 }
0x1045   :  { %2033 = vadd.xlane.f32.xlu1 %v2032_v28 }
0x1053   :  { %2192 = vrot.lane.b32.xlu0 %v3756_v46, %s3436_s4 }
0x1056   :  { %2142 = vrot.lane.b32.xlu1 %v3753_v42, %s3436_s4 }
0x1057   :  { %2190 = vrot.lane.b32.xlu0 %v3773_v59, %s3437_s27 }
0x105a   :  { %2140 = vrot.lane.b32.xlu1 %v3763_v55, %s3437_s27 }
0x10ca   :  { %v2031_v29 = vpop.xlane.xlu0 %2030 }
0x10cb   :  { %3349 = vrcp.f32 %v2031_v29  ;;  %v3284_v29 = vld [vmem:[%s4295_s5 + $0x2c] ss:$16 sps:$4 sm:$0xff]  }
0x10ce   :  { %v2193_v59 = vpop.permute.xlu0 %2192 }
0x10cf   :  { %v2198_v53 = vsel %vm587_vm1, %v2193_v59, 0  ;;  %v3291_v59 = vld [vmem:[%s4295_s5 + $0x60] ss:$16 sps:$4 sm:$0xff]  }
0x10d2   :  { %v2034_v40 = vpop.xlane.xlu1 %2033  ;;  %v2191_v56 = vpop.permute.xlu0 %2190 }
0x10d3   :  { %3351 = vrcp.f32 %v2034_v40  ;;  %v3279_v40 = vld [vmem:[%s4295_s5 + $0x20] ss:$16 sps:$4 sm:$0xff]  }
0x10d5   :  { %v3350_v41 = vpop.eup %3349 }
0x10d6   :  { %v2037_v43 = vmul.f32 %v3350_v41, %v3346_v22  ;;  %v2143_v47 = vpop.permute.xlu1 %2142  ;;  %v3282_v41 = vld [vmem:[%s4295_s5 + $0x28] ss:$16 sps:$4 sm:$0xff]  }
0x10d7   :  { %v2148_v49 = vsel %vm587_vm1, %v2143_v47, 0  ;;  %v3290_v47 = vld [vmem:[%s4295_s5 + $0x4c] ss:$16 sps:$4 sm:$0xff]  }
0x10d8   :  { %2040 = vst.msk [vmem:[#allocation4 + $0x30] sm:$0xff] %vm587_vm1, %v2037_v43  ;;  %v2042_v46 = vpack.c.bf16 %v2037_v43, %v2037_v43  ;;  %v3287_v43 = vld [vmem:[%s4295_s5 + $0x44] ss:$16 sps:$4 sm:$0xff]  }
0x10da   :  { %3075 = vmatmul.mubr.msk.bf16.vlgmr.msra.gmra.mrb[28].mxu0 %vm587_vm1, %v2042_v46  ;;  %v2141_v52 = vpop.permute.xlu1 %2140  ;;  %v3285_v46 = vld [vmem:[%s4295_s5 + $0x40] ss:$16 sps:$4 sm:$0xff]  }
0x10db   :  { %3085 = vmatpush3.bf16.xpose.msra.mxu0 %v2148_v49  ;;  %3086 = vmatprep.mubr.msk.bf16.mxu0 %vm3422_vm0, %v3421_v36  ;;  %v3288_v49 = vld [vmem:[%s4295_s5 + $0x48] ss:$16 sps:$4 sm:$0xff]  }
0x10dc   :  { %3096 = vmatprep.subr.bf16.mxu0 %v3421_v36 }
0x10dd   :  { %v3352_v42 = vpop.eup %3351 }
0x10de   :  { %v2038_v55 = vmul.f32 %v3352_v42, %v3348_v24  ;;  %v3293_v42 = vld [vmem:[%s4295_s5 + $0x64] ss:$16 sps:$4 sm:$0xff]  }
0x10e0   :  { %2041 = vst.msk [vmem:[#allocation4 + $0x70] sm:$0xff] %vm587_vm1, %v2038_v55  ;;  %v2043_v51 = vpack.c.bf16 %v2038_v55, %v2038_v55  ;;  %v3296_v55 = vld [vmem:[%s4295_s5 + $0x6c] ss:$16 sps:$4 sm:$0xff]  }
0x10e2   :  { %3081 = vmatmul.mubr.msk.bf16.vlgmr.msra.gmra.mrb[88].mxu1 %vm587_vm1, %v2043_v51  ;;  %3087 = vmatmul.mubr.msk.bf16.vlgmr.msra.gmra.mrb[32].mxu0 %vm587_vm1, %v2141_v52  ;;  %v3294_v51 = vld [vmem:[%s4295_s5 + $0x68] ss:$16 sps:$4 sm:$0xff]  }
0x10e3   :  { %3091 = vmatpush3.bf16.xpose.msra.mxu1 %v2198_v53  ;;  %3092 = vmatprep.mubr.msk.bf16.mxu1 %vm3422_vm0, %v3421_v36 }
0x10e4   :  { %3102 = vmatprep.subr.bf16.mxu1 %v3421_v36  ;;  %3098 = vmatprep.mubr.msk.bf16.mxu0 %vm3422_vm0, %v3421_v36 }
0x10ea   :  { %3093 = vmatmul.mubr.msk.bf16.vlgmr.msra.gmra.mrb[92].mxu1 %vm587_vm1, %v2191_v56 }
0x10eb   :  { %3104 = vmatprep.mubr.msk.bf16.mxu1 %vm3422_vm0, %v3421_v36 }
0x11ad   :  { %v2086_v60 = vpop.f32.mrb[28].mxu0 }
0x11ae   :  { %v3076_v61 = vpop.f32.mrb[29].mxu0 }
0x11af   :  { %v2089_v63 = vpop.f32.mrb[30].mxu0 }
0x11b0   :  { %v3077_v0 = vpop.f32.mrb[31].mxu0 }
0x11b5   :  { %v2134_v1 = vpop.f32.mrb[88].mxu1  ;;  %v2184_v2 = vpop.f32.mrb[32].mxu0 }
0x11b6   :  { %v3167_v3 = vpack.i.bf16 %v2134_v1, %v2086_v60  ;;  %v2185_v4 = vadd.f32 %v3785_v62, %v2184_v2  ;;  %v3082_v6 = vpop.f32.mrb[89].mxu1  ;;  %v3088_v7 = vpop.f32.mrb[33].mxu0  ;;  %v3438_v60 = vmov 0  }
0x11b7   :  { %v2137_v8 = vpop.f32.mrb[90].mxu1  ;;  %v2187_v9 = vpop.f32.mrb[34].mxu0 }
0x11b8   :  { %v3083_v10 = vpop.f32.mrb[91].mxu1  ;;  %v3089_v11 = vpop.f32.mrb[35].mxu0  ;;  %v2240_v12 = vsel %vm587_vm1, %v2185_v4, -inf }
0x11b9   :  { %2241 = vmax.xlane.f32.xlu1 %v2240_v12 }
0x11bd   :  { %v2234_v13 = vpop.f32.mrb[92].mxu1 }
0x11be   :  { %v2235_v36 = vadd.f32 %v3789_v5, %v2234_v13  ;;  %v3094_v14 = vpop.f32.mrb[93].mxu1 }
0x11bf   :  { %v2237_v15 = vpop.f32.mrb[94].mxu1 }
0x11c0   :  { %v3095_v16 = vpop.f32.mrb[95].mxu1  ;;  %v2243_v17 = vsel %vm587_vm1, %v2235_v36, -inf }
0x11c1   :  { %2244 = vmax.xlane.f32.xlu0 %v2243_v17 }
0x1246   :  { %v2242_v18 = vpop.xlane.xlu1 %2241 }
0x1247   :  { %v2246_v62 = vsub.f32 %v2185_v4, %v2242_v18 }
0x1249   :  { %v2248_v19 = vmul.f32 1.442695, %v2246_v62 }
0x124b   :  { %3353 = vpow2.f32 %v2248_v19 }
0x124e   :  { %v2245_v20 = vpop.xlane.xlu0 %2244 }
0x124f   :  { %v2247_v21 = vsub.f32 %v2235_v36, %v2245_v20 }
0x1251   :  { %v2250_v22 = vmul.f32 1.442695, %v2247_v21 }
0x1253   :  { %3355 = vpow2.f32 %v2250_v22 }
0x1255   :  { %v3354_v23 = vpop.eup %3353 }
0x1256   :  { %v2252_v24 = vsel %vm587_vm1, %v3354_v23, 0.0 }
0x1257   :  { %2253 = vadd.xlane.f32.xlu0 %v2252_v24 }
0x125d   :  { %v3356_v28 = vpop.eup %3355 }
0x125e   :  { %v2255_v5 = vsel %vm587_vm1, %v3356_v28, 0.0 }
0x125f   :  { %2256 = vadd.xlane.f32.xlu1 %v2255_v5 }
0x126d   :  { %2267 = vrot.lane.b32.xlu0 %v3771_v58, %s3437_s27 }
0x1270   :  { %2315 = vrot.lane.b32.xlu1 %v3805_v26, %s3437_s27 }
0x1271   :  { %3148 = vrot.lane.b32.xlu0 %v3147_v33, %s3434_s25 }
0x1274   :  { %3143 = vrot.lane.b32.xlu1 %v3142_v37, %s3436_s4 }
0x1275   :  { %3158 = vrot.lane.b32.xlu0 %v3157_v48, %s3430_s21  ;;  %v3275_v48 = vld [vmem:[%s4295_s5 + $0x4] ss:$16 sps:$4 sm:$0xff]  }
0x1278   :  { %3153 = vrot.lane.b32.xlu1 %v3152_v38, %s3432_s23 }
0x1279   :  { %3168 = vrot.lane.b32.xlu0 %v3167_v3, %s3427_s18 }
0x127c   :  { %3163 = vrot.lane.b32.xlu1 %v3162_v57, %s3428_s19  ;;  %v3281_v57 = vld [vmem:[%s4295_s5 + $0x24] ss:$16 sps:$4 sm:$0xff]  }
0x12e4   :  { %v2254_v58 = vpop.xlane.xlu0 %2253 }
0x12e5   :  { %3357 = vrcp.f32 %v2254_v58 }
0x12e8   :  { %v2268_v26 = vpop.permute.xlu0 %2267 }
0x12e9   :  { %v2273_v31 = vsel %vm712_vm2, %v2268_v26, 0 }
0x12ea   :  { %3097 = vmatpush3.bf16.msra.mxu0 %v2273_v31 }
0x12eb   :  { %2540 = vmatprep.subr.bf16.mxu0 %v3275_v48 }
0x12ec   :  { %v2257_v35 = vpop.xlane.xlu1 %2256  ;;  %v3149_v6 = vpop.permute.xlu0 %3148 }
0x12ed   :  { %3359 = vrcp.f32 %v2257_v35  ;;  %v3151_v14 = vunpack.i.h.bf16 %v3149_v6  ;;  %v3150_v15 = vunpack.i.l.bf16 %v3149_v6 }
0x12ef   :  { %v3358_v37 = vpop.eup %3357 }
0x12f0   :  { %v2260_v27 = vmul.f32 %v3358_v37, %v3354_v23  ;;  %v2316_v32 = vpop.permute.xlu1 %2315  ;;  %v3159_v10 = vpop.permute.xlu0 %3158 }
0x12f1   :  { %v2321_v33 = vsel %vm712_vm2, %v2316_v32, 0  ;;  %v3161_v22 = vunpack.i.h.bf16 %v3159_v10  ;;  %v3160_v23 = vunpack.i.l.bf16 %v3159_v10 }
0x12f2   :  { %2263 = vst.msk [vmem:[#allocation4 + $0x38] sm:$0xff] %vm587_vm1, %v2260_v27  ;;  %3103 = vmatpush3.bf16.msra.mxu1 %v2321_v33  ;;  %v2265_v25 = vpack.c.bf16 %v2260_v27, %v2260_v27 }
0x12f3   :  { %2583 = vmatprep.subr.bf16.mxu1 %v3278_v54 }
0x12f4   :  { %3099 = vmatmul.mubr.msk.bf16.vlgmr.msra.gmra.mrb[36].mxu0 %vm587_vm1, %v2265_v25  ;;  %v3144_v4 = vpop.permute.xlu1 %3143 }
0x12f5   :  { %2541 = vmatpush1.bf16.msra.mxu0 %v3273_v45  ;;  %2572 = vmatprep.mubr.bf16.mxu0 %v3438_v60  ;;  %v3146_v8 = vunpack.i.h.bf16 %v3144_v4  ;;  %v3145_v9 = vunpack.i.l.bf16 %v3144_v4  ;;  %v3365_v45 = vld [vmem:[%s4290_s0] sm:$0xff] }
0x12f6   :  { %2542 = vmatprep.subr.bf16.mxu0 %v3281_v57 }
0x12f7   :  { %v3360_v34 = vpop.eup %3359  ;;  %v2420_v11 = vsel %vm587_vm1, %v3830_v44, %v3146_v8  ;;  %v2419_v12 = vsel %vm587_vm1, %v3828_v39, %v3145_v9  ;;  %v3169_v44 = vpop.permute.xlu0 %3168  ;;  %v3372_v8 = vld [vmem:[%s4290_s0 + $0x38] sm:$0xff] }
0x12f8   :  { %v2261_v38 = vmul.f32 %v3360_v34, %v3356_v28  ;;  %v3154_v7 = vpop.permute.xlu1 %3153  ;;  %v2422_v17 = vsel %vm2421_vm3, %v2419_v12, %v3150_v15  ;;  %v2423_v18 = vsel %vm2421_vm3, %v2420_v11, %v3151_v14  ;;  %v3171_v58 = vunpack.i.h.bf16 %v3169_v44 }
0x12f9   :  { %2543 = vmatpush1.bf16.msra.mxu0 %v3279_v40  ;;  %v3156_v13 = vunpack.i.h.bf16 %v3154_v7  ;;  %v3155_v36 = vunpack.i.l.bf16 %v3154_v7  ;;  %v3170_v26 = vunpack.i.l.bf16 %v3169_v44  ;;  %v3367_v40 = vld [vmem:[%s4290_s0 + $0x8] sm:$0xff] }
0x12fa   :  { %2264 = vst.msk [vmem:[#allocation4 + $0x78] sm:$0xff] %vm587_vm1, %v2261_v38  ;;  %v2266_v30 = vpack.c.bf16 %v2261_v38, %v2261_v38  ;;  %2544 = vmatprep.subr.bf16.mxu0 %v3287_v43 }
0x12fb   :  { %v2425_v62 = vsel %vm2424_vm4, %v2422_v17, %v3155_v36  ;;  %v2426_v19 = vsel %vm2424_vm4, %v2423_v18, %v3156_v13 }
0x12fc   :  { %3105 = vmatmul.mubr.msk.bf16.vlgmr.msra.gmra.mrb[96].mxu1 %vm587_vm1, %v2266_v30  ;;  %v3164_v16 = vpop.permute.xlu1 %3163  ;;  %v2428_v24 = vsel %vm2427_vm5, %v2425_v62, %v3160_v23  ;;  %v2429_v28 = vsel %vm2427_vm5, %v2426_v19, %v3161_v22 }
0x12fd   :  { %2584 = vmatpush1.bf16.msra.mxu1 %v3276_v50  ;;  %2545 = vmatpush1.bf16.msra.mxu0 %v3285_v46  ;;  %v3166_v20 = vunpack.i.h.bf16 %v3164_v16  ;;  %v3165_v21 = vunpack.i.l.bf16 %v3164_v16  ;;  %v3366_v50 = vld [vmem:[%s4290_s0 + $0x10] sm:$0xff] }
0x12fe   :  { %2585 = vmatprep.subr.bf16.mxu1 %v3284_v29  ;;  %2546 = vmatprep.subr.bf16.mxu0 %v3293_v42 }
0x12ff   :  { %2615 = vmatprep.mubr.bf16.mxu1 %v3438_v60  ;;  %v2431_v39 = vsel %vm2430_vm6, %v2428_v24, %v3165_v21  ;;  %v2432_v5 = vsel %vm2430_vm6, %v2429_v28, %v3166_v20 }
0x1300   :  { %v2434_v27 = vsel %vm2433_vm7, %v2431_v39, %v3170_v26  ;;  %v2435_v32 = vsel %vm2433_vm7, %v2432_v5, %v3171_v58 }
0x1301   :  { %2586 = vmatpush1.bf16.msra.mxu1 %v3282_v41  ;;  %2547 = vmatpush1.bf16.msra.mxu0 %v3291_v59 }
0x1302   :  { %2587 = vmatprep.subr.bf16.mxu1 %v3290_v47 }
0x1305   :  { %2588 = vmatpush1.bf16.msra.mxu1 %v3288_v49  ;;  %v3368_v49 = vld [vmem:[%s4290_s0 + $0x20] sm:$0xff] }
0x1306   :  { %2589 = vmatprep.subr.bf16.mxu1 %v3296_v55 }
0x1309   :  { %2590 = vmatpush1.bf16.msra.mxu1 %v3294_v51 }
0x13c7   :  { %v2309_v52 = vpop.f32.mrb[36].mxu0 }
0x13c8   :  { %v3100_v53 = vpop.f32.mrb[37].mxu0 }
0x13c9   :  { %v2312_v56 = vpop.f32.mrb[38].mxu0  ;;  %v3369_v53 = vld [vmem:[%s4290_s0 + $0x28] sm:$0xff] }
0x13ca   :  { %v3101_v61 = vpop.f32.mrb[39].mxu0 }
0x13cb   :  { %v3370_v61 = vld [vmem:[%s4290_s0 + $0x18] sm:$0xff] }
0x13cf   :  { %v2357_v63 = vpop.f32.mrb[96].mxu1 }
0x13d0   :  { %v3172_v0 = vpack.i.bf16 %v2357_v63, %v2309_v52  ;;  %v3106_v1 = vpop.f32.mrb[97].mxu1 }
0x13d1   :  { %v2360_v2 = vpop.f32.mrb[98].mxu1  ;;  %v3371_v1 = vld [vmem:[%s4290_s0 + $0x30] sm:$0xff]  ;;  %s3439_s0 = smov [#allocation4]  }
0x13d2   :  { %3173 = vrot.lane.b32.xlu1 %v3172_v0, %s3424_s3  ;;  %v3107_v3 = vpop.f32.mrb[99].mxu1  ;;  %s2707_s26 = sshll.u32 %s3439_s0, 4  ;;  %s2708_s26 = int_to_ptr.vmem [resolvable:$true] %s2707_s26 }
0x13d3   :  { %s3373_s27 = scalar_lea.vmem %s2708_s26, 2048  ;;  %p3378_p1 = scmp.lt.s32.totalorder %s2708_s26, %s2708_s26 }
0x13d4   :  { %p3374_p0 = scmp.ne.s32.totalorder %s2708_s26, %s3373_s27  ;;  %p3379_p2 = scmp.lt.s32.totalorder %s3373_s27, %s3373_s27 }
0x13d6   :  { %p3380_p3 = por %p3379_p2, %p3378_p1 }
0x13d8   :  { %p3381_p4 = pnand %p3380_p3, %p3374_p0 }
0x1444   :  { %v3174_v31 = vpop.permute.xlu1 %3173 }
0x1445   :  { %v3176_v35 = vunpack.i.h.bf16 %v3174_v31  ;;  %v3175_v37 = vunpack.i.l.bf16 %v3174_v31 }
0x1447   :  { %v2438_v33 = vsel %vm2436_vm8, %v2435_v32, %v3176_v35  ;;  %v2437_v25 = vsel %vm2436_vm8, %v2434_v27, %v3175_v37 }
0x1448   :  { %v2439_v34 = vpack.c.bf16 %v2438_v33, %v2437_v25 }
0x144a   :  { %2840 = vmatmul.mubr.msk.bf16.vlgmr.msra.gmra.mrb[40].mxu0 %vm2536_vm9, %v2439_v34  ;;  %2841 = vmatmul.mubr.msk.bf16.vlgmr.msra.gmra.mrb[100].mxu1 %vm2536_vm9, %v2439_v34 }
0x151d   :  { %v2574_v38 = vpop.f32.mrb[40].mxu0  ;;  %v2617_v30 = vpop.f32.mrb[100].mxu1 }
0x151e   :  { %v4195_v48 = vadd.f32 %v3365_v45, %v2574_v38  ;;  %v4200_v54 = vadd.f32 %v3366_v50, %v2617_v30  ;;  %v2576_v57 = vpop.f32.mrb[41].mxu0  ;;  %v2619_v29 = vpop.f32.mrb[101].mxu1 }
0x151f   :  { %v4205_v41 = vadd.f32 %v3367_v40, %v2576_v57  ;;  %v2578_v43 = vpop.f32.mrb[42].mxu0  ;;  %v2621_v47 = vpop.f32.mrb[102].mxu1  ;;  %v4228_v63 = vadd.f32 %v3370_v61, %v2619_v29 }
0x1520   :  { %v2636_v46 = vmul.f32 %v4195_v48, %v4195_v48  ;;  %v4212_v42 = vadd.f32 %v3368_v49, %v2578_v43  ;;  %v2580_v55 = vpop.f32.mrb[43].mxu0  ;;  %v2623_v59 = vpop.f32.mrb[103].mxu1  ;;  %v2638_v60 = vmul.f32 %v4200_v54, %v4200_v54  ;;  %v4235_v2 = vadd.f32 %v3371_v1, %v2621_v47 }
0x1521   :  { %v2626_v51 = vadd.f32 %v4205_v41, %v4195_v48  ;;  %v2637_v52 = vmul.f32 %v4205_v41, %v4205_v41  ;;  %v4221_v56 = vadd.f32 %v3369_v53, %v2580_v55  ;;  %v4245_v9 = vadd.f32 %v3372_v8, %v2623_v59 }
0x1522   :  { %v2640_v0 = vmul.f32 %v4212_v42, %v4212_v42  ;;  %v2642_v36 = vmul.f32 %v4235_v2, %v4235_v2  ;;  %v2639_v15 = vmul.f32 %v4228_v63, %v4228_v63 }
0x1523   :  { %v2631_v3 = vadd.f32 %v4221_v56, %v4212_v42  ;;  %v2641_v4 = vmul.f32 %v4221_v56, %v4221_v56  ;;  %v2627_v6 = vadd.f32 %v2626_v51, %v4200_v54  ;;  %v2644_v7 = vadd.f32 %v2637_v52, %v2636_v46 }
0x1524   :  { %v2643_v18 = vmul.f32 %v4245_v9, %v4245_v9 }
0x1525   :  { %v2628_v10 = vadd.f32 %v2627_v6, %v4228_v63  ;;  %v2632_v11 = vadd.f32 %v2631_v3, %v4235_v2  ;;  %v2645_v12 = vadd.f32 %v2644_v7, %v2638_v60  ;;  %v2649_v13 = vadd.f32 %v2641_v4, %v2640_v0 }
0x1527   :  { %2629 = vadd.xlane.f32.xlu0 %v2628_v10  ;;  %v2633_v14 = vadd.f32 %v2632_v11, %v4245_v9  ;;  %v2646_v16 = vadd.f32 %v2645_v12, %v2639_v15  ;;  %v2650_v17 = vadd.f32 %v2649_v13, %v2642_v36 }
0x1529   :  { %2634 = vadd.xlane.f32.xlu1 %v2633_v14  ;;  %v2651_v62 = vadd.f32 %v2650_v17, %v2643_v18 }
0x152b   :  { %2647 = vadd.xlane.f32.xlu0 %v2646_v16 }
0x152f   :  { %2652 = vadd.xlane.f32.xlu0 %v2651_v62 }
0x1530   :  { %3384 = shalt.err (!%p3381_p4)
}
0x1531   :  { %s3385_s30 = scalar_lea.hbm %s4297_s7, 2048 }
0x1532   :  { %p3386_p5 = scmp.ne.s32.totalorder %s4297_s7, %s3385_s30  ;;  %p3389_p6 = scmp.lt.u32.totalorder %s3385_s30, %s4297_s7 }
0x1534   :  { %p3391_p7 = pnand %p3389_p6, %p3386_p5 }
0x1536   :  { %3394 = shalt.err (!%p3391_p7)
}
0x1537   :  { %s3440_s12 = smov 128  }
0x1538   :  { %2713 = dma.vmem_to_hbm [thread:$0]  %s2708_s26, 2048, %s4297_s7, [#allocation5], %s3440_s12, %s3440_s12, %s3436_s4  }
0x1539   :  { %s3441_s7 = smov [#allocation2]  }
0x153a   :  { %s2695_s4 = sshll.u32 %s3441_s7, 4  ;;  %s2696_s4 = int_to_ptr.vmem [resolvable:$true] %s2695_s4 }
0x153b   :  { %s3395_s13 = scalar_lea.vmem %s2696_s4, 1024  ;;  %p3400_p9 = scmp.lt.s32.totalorder %s2696_s4, %s2696_s4 }
0x153c   :  { %p3396_p8 = scmp.ne.s32.totalorder %s2696_s4, %s3395_s13  ;;  %p3401_p10 = scmp.lt.s32.totalorder %s3395_s13, %s3395_s13 }
0x153e   :  { %p3402_p11 = por %p3401_p10, %p3400_p9 }
0x1540   :  { %p3403_p12 = pnand %p3402_p11, %p3396_p8 }
0x15b4   :  { %v2630_v19 = vpop.xlane.xlu0 %2629 }
0x15b5   :  { %v2654_v20 = vmul.f32 0.001953125, %v2630_v19 }
0x15b6   :  { %v2635_v21 = vpop.xlane.xlu1 %2634 }
0x15b7   :  { %v2655_v23 = vmul.f32 0.001953125, %v2635_v21  ;;  %v2658_v44 = vmul.f32 %v2654_v20, %v2654_v20  ;;  %v2662_v37 = vsub.f32 %v4195_v48, %v2654_v20  ;;  %v2663_v27 = vsub.f32 %v4205_v41, %v2654_v20 }
0x15b8   :  { %v2648_v22 = vpop.xlane.xlu0 %2647  ;;  %v2664_v32 = vsub.f32 %v4200_v54, %v2654_v20  ;;  %v2665_v33 = vsub.f32 %v4228_v63, %v2654_v20 }
0x15b9   :  { %v2656_v24 = vmul.f32 0.001953125, %v2648_v22  ;;  %v2659_v58 = vmul.f32 %v2655_v23, %v2655_v23  ;;  %v2666_v50 = vsub.f32 %v4212_v42, %v2655_v23  ;;  %v2667_v57 = vsub.f32 %v4221_v56, %v2655_v23 }
0x15ba   :  { %v2668_v29 = vsub.f32 %v4235_v2, %v2655_v23  ;;  %v2669_v48 = vsub.f32 %v4245_v9, %v2655_v23 }
0x15bb   :  { %v2660_v28 = vsub.f32 %v2656_v24, %v2658_v44 }
0x15bc   :  { %v2653_v39 = vpop.xlane.xlu0 %2652 }
0x15bd   :  { %v2670_v5 = vadd.f32 1e-05, %v2660_v28  ;;  %v2657_v26 = vmul.f32 0.001953125, %v2653_v39 }
0x15bf   :  { %3361 = vrsqrt.f32 %v2670_v5  ;;  %v2661_v31 = vsub.f32 %v2657_v26, %v2659_v58 }
0x15c1   :  { %v2671_v35 = vadd.f32 1e-05, %v2661_v31 }
0x15c3   :  { %3363 = vrsqrt.f32 %v2671_v35 }
0x15c9   :  { %v3362_v25 = vpop.eup %3361 }
0x15ca   :  { %v2674_v34 = vmul.f32 %v3362_v25, %v2662_v37  ;;  %v2675_v38 = vmul.f32 %v3362_v25, %v2663_v27  ;;  %v2676_v30 = vmul.f32 %v3362_v25, %v2664_v32  ;;  %v2677_v45 = vmul.f32 %v3362_v25, %v2665_v33 }
0x15cc   :  { %2682 = vst [vmem:[#allocation2] sm:$0xff] %v2674_v34  ;;  %2683 = vst [vmem:[#allocation2 + $0x8] sm:$0xff] %v2675_v38 }
0x15cd   :  { %2684 = vst [vmem:[#allocation2 + $0x10] sm:$0xff] %v2676_v30  ;;  %2685 = vst [vmem:[#allocation2 + $0x18] sm:$0xff] %v2677_v45  ;;  %v3364_v54 = vpop.eup %3363 }
0x15ce   :  { %v2678_v40 = vmul.f32 %v3364_v54, %v2666_v50  ;;  %v2679_v41 = vmul.f32 %v3364_v54, %v2667_v57  ;;  %v2680_v43 = vmul.f32 %v3364_v54, %v2668_v29  ;;  %v2681_v47 = vmul.f32 %v3364_v54, %v2669_v48 }
0x15d0   :  { %2686 = vst [vmem:[#allocation2 + $0x20] sm:$0xff] %v2678_v40  ;;  %2687 = vst [vmem:[#allocation2 + $0x28] sm:$0xff] %v2679_v41 }
0x15d1   :  { %2688 = vst [vmem:[#allocation2 + $0x30] sm:$0xff] %v2680_v43  ;;  %2689 = vst [vmem:[#allocation2 + $0x38] sm:$0xff] %v2681_v47 }
0x15d2   :  { %3406 = shalt.err (!%p3403_p12)
}
0x15d3   :  { %s3407_s2 = scalar_lea.hbm %s4296_s6, 1024 }
0x15d4   :  { %p3408_p13 = scmp.ne.s32.totalorder %s4296_s6, %s3407_s2  ;;  %p3411_p0 = scmp.lt.u32.totalorder %s3407_s2, %s4296_s6 }
0x15d6   :  { %p3413_p1 = pnand %p3411_p0, %p3408_p13 }
0x15d8   :  { %3416 = shalt.err (!%p3413_p1)
}
0x15d9   :  { %s3442_s19 = smov 512  }
0x15da   :  { %2701 = dma.vmem_to_hbm [thread:$0]  %s2696_s4, 1024, %s4296_s6, [#allocation3], %s3442_s19, %s3442_s19, %s3430_s21  }
0x15db   :  { %3417 = dma.done.wait [#allocation3], 1024  }
0x15dc   :  { %3418 = vsyncadd [#allocation3], 4294966272 }
0x15dd   :  { %3419 = dma.done.wait [#allocation5], 2048  }
0x15de   :  { %3420 = vsyncadd [#allocation5], 4294965248 }
0x15df   :  { %2720 = vsyncpa [#allocation3], 1 }
0x15e0   :  { %2721 = vsyncpa [#allocation5], 1 }

</bundles_post_ra>
